<compile_context>
chip_gen: v7x
topology: tpu7x:2x2x1
jax: 0.10.0
libtpu: 0.0.40
codegen_flags: <defaults>
</compile_context>

<pallas_src>
import math

import jax
import jax.numpy as jnp
from jax.experimental import pallas as pl
from jax.experimental.pallas import tpu as pltpu


def _softplus(x):
    # PyTorch softplus (beta=1, threshold=20)
    return jnp.where(x > 20.0, x, jnp.log1p(jnp.exp(jnp.minimum(x, 20.0))))


def _round_up(v, m):
    return ((v + m - 1) // m) * m


def ddsurv_kernel(
    x_ref,                       # (TB, F)
    w1_ref, b1_ref,              # (F, H1), (1, H1)
    w2_ref, b2_ref,              # (H1, H2), (1, H2)
    wx_ref,                      # (H2, 3Hg+1)  packed [Wir|Wiz|Win|wfc]
    bfc_ref,                     # (1, 1)
    gp_ref,                      # (L, 3Hg)     pe @ [Wir|Wiz|Win] + bx  (precomputed)
    whh_ref,                     # (Hg, 3Hg)    packed [Whr|Whz|Whn]
    bhn_ref,                     # (1, Hg)
    wout_row_ref, bout_ref,      # (1, Hg), (1, 1)
    risk_ref,                    # out: (TB, 1)
    ev_ref,                      # out: (L, TB)   lane-dense
    gall_ref,                    # scratch: (L, TB, 3Hg)
    h_hist,                      # scratch: (L, TB, Hg)
):
    x = x_ref[...]

    # --- static DeepSurv feature MLP (ReLU DenseBlocks) ---
    h1 = jnp.maximum(
        jnp.dot(x, w1_ref[...], preferred_element_type=jnp.float32) + b1_ref[...], 0.0)
    feats = jnp.maximum(
        jnp.dot(h1, w2_ref[...], preferred_element_type=jnp.float32) + b2_ref[...], 0.0)

    Hg = whh_ref.shape[0]
    L = ev_ref.shape[0]
    TB = feats.shape[0]
    G3 = 3 * Hg

    # --- one packed matmul gives GRU input projections AND the risk logits ---
    # wx columns [0:3Hg) are [Wir|Wiz|Win], column 3Hg is wfc (rides the MXU
    # padding lanes for free).
    g_ext = jnp.dot(feats, wx_ref[...], preferred_element_type=jnp.float32)  # (TB, 3Hg+1)
    risk_ref[...] = _softplus(g_ext[:, G3:G3 + 1] + bfc_ref[...])

    # --- per-step input term, materialized once (bounds gf's live range) ---
    gf = g_ext[:, :G3]                                                        # (TB, 3Hg)
    gall_ref[...] = gf[None, :, :] + gp_ref[...][:, None, :]                  # (L, TB, 3Hg)

    bhn = jnp.broadcast_to(bhn_ref[...], (TB, Hg))                            # hoisted
    whh = whh_ref[...]

    # --- 1-layer GRU recurrence: one fused (Hg, 3Hg) MXU push per step ---
    h = jnp.zeros((TB, Hg), jnp.float32)
    for t in range(L):                                                        # static unroll
        gx = gall_ref[t]                                                      # (TB, 3Hg)
        hh = jnp.dot(h, whh, preferred_element_type=jnp.float32)              # (TB, 3Hg)
        r = jax.nn.sigmoid(gx[:, 0:Hg] + hh[:, 0:Hg])
        z = jax.nn.sigmoid(gx[:, Hg:2 * Hg] + hh[:, Hg:2 * Hg])
        n = jnp.tanh(gx[:, 2 * Hg:3 * Hg] + r * (hh[:, 2 * Hg:3 * Hg] + bhn))
        h = (1.0 - z) * n + z * h
        h_hist[t] = h

    # --- output head, hoisted out of the loop; one lane-dense (L, TB) store ---
    hs = h_hist[...]                                                          # (L, TB, Hg)
    ev_logits = jnp.sum(hs * wout_row_ref[...][None, :, :], axis=-1) + bout_ref[...]
    ev_ref[...] = jax.nn.sigmoid(ev_logits)                                   # (L, TB)


def positional_encoding(max_len, d_model):
    dm = d_model + (d_model % 2)
    position = jnp.arange(max_len, dtype=jnp.float32)[:, None]
    div_term = jnp.exp(
        jnp.arange(0, dm, 2, dtype=jnp.float32) * (-math.log(10000.0) / dm))
    pe = jnp.zeros((max_len, dm), jnp.float32)
    pe = pe.at[:, 0::2].set(jnp.sin(position * div_term))
    pe = pe.at[:, 1::2].set(jnp.cos(position * div_term))
    return pe[:, :d_model]


def dynamic_deepsurv(x, params, max_length):
    B, F = x.shape
    L = max_length
    Hg = params["whr"].shape[0]

    # Pack weights once (in a real model this happens at parameter-prep time).
    wx_gru = jnp.concatenate([params["wir"], params["wiz"], params["win"]], axis=1)   # (H2, 3Hg)
    bx = jnp.concatenate([params["br"], params["bz"], params["bin"]], axis=1)         # (1, 3Hg)
    wx_ext = jnp.concatenate([wx_gru, params["wfc"]], axis=1)                         # (H2, 3Hg+1)
    whh = jnp.concatenate([params["whr"], params["whz"], params["whn"]], axis=1)      # (Hg, 3Hg)
    wout_row = params["wout"].T                                                       # (1, Hg)

    # Grid-invariant positional-encoding projection: compute once outside the kernel.
    gp = params["pe"] @ wx_gru + bx                                                   # (L, 3Hg)

    # --- batch tiling ---
    # Lane-dense (L, TB) ev output requires TB % 128 == 0 whenever the batch is
    # gridded; when B_pad <= 128 a single full tile avoids that constraint and
    # all padding waste. For larger batches use 128-aligned tiles capped at 512
    # rows and aim for >= 2 tiles so the "parallel" axis spans both v7x cores.
    B_pad = _round_up(B, 8)
    if B_pad <= 128:
        TB = B_pad
    else:
        TB = min(512, _round_up(B_pad // 2, 128))
        B_pad = _round_up(B_pad, TB)
    x_p = x if B_pad == B else jnp.pad(x, ((0, B_pad - B), (0, 0)))

    weights = [
        params["w1"], params["b1"], params["w2"], params["b2"],
        wx_ext, params["bfc"], gp,
        whh, params["bhn"], wout_row, params["bout"],
    ]

    def rep_spec(a):
        nd = a.ndim
        return pl.BlockSpec(a.shape, lambda i, _n=nd: (0,) * _n)

    in_specs = [pl.BlockSpec((TB, F), lambda i: (i, 0))] + [rep_spec(w) for w in weights]

    risk, ev = pl.pallas_call(
        ddsurv_kernel,
        out_shape=(
            jax.ShapeDtypeStruct((B_pad, 1), jnp.float32),
            jax.ShapeDtypeStruct((L, B_pad), jnp.float32),
        ),
        grid=(B_pad // TB,),
        in_specs=in_specs,
        out_specs=(
            pl.BlockSpec((TB, 1), lambda i: (i, 0)),
            pl.BlockSpec((L, TB), lambda i: (0, i)),
        ),
        scratch_shapes=[
            pltpu.VMEM((L, TB, 3 * Hg), jnp.float32),
            pltpu.VMEM((L, TB, Hg), jnp.float32),
        ],
        compiler_params=pltpu.CompilerParams(dimension_semantics=("parallel",)),
    )(x_p, *weights)

    # Wrapper-side layout fixup (cheap XLA transpose), keep PyTorch (B, L) view.
    return {"risk_pred": risk[:B], "event_seq": ev[:, :B].T}


def _reference(x, p, max_length):
    """Pure-JAX reference replicating the PyTorch forward (eval mode)."""
    h1 = jnp.maximum(x @ p["w1"] + p["b1"], 0.0)
    feats = jnp.maximum(h1 @ p["w2"] + p["b2"], 0.0)
    risk = _softplus(feats @ p["wfc"] + p["bfc"])
    B = x.shape[0]
    Hg = p["whr"].shape[0]
    h = jnp.zeros((B, Hg), jnp.float32)
    outs = []
    for t in range(max_length):
        x_t = feats + p["pe"][t][None, :]
        r = jax.nn.sigmoid(x_t @ p["wir"] + h @ p["whr"] + p["br"])
        z = jax.nn.sigmoid(x_t @ p["wiz"] + h @ p["whz"] + p["bz"])
        n = jnp.tanh(x_t @ p["win"] + p["bin"] + r * (h @ p["whn"] + p["bhn"]))
        h = (1.0 - z) * n + z * h
        outs.append(jax.nn.sigmoid(h @ p["wout"] + p["bout"])[:, 0])
    return {"risk_pred": risk, "event_seq": jnp.stack(outs, axis=1)}


if __name__ == "__main__":
    # small, module-consistent shapes
    B, F = 2, 16           # batch, static input features
    H1, H2 = 32, 32        # DenseBlock units (H2 == hidden_units fed to GRU/PE)
    Hg = 32                # rnn__units
    L = 8                  # max_length

    key = jax.random.PRNGKey(0)
    ks = jax.random.split(key, 20)
    init = lambda k, shape, s=0.1: (s * jax.random.normal(k, shape)).astype(jnp.float32)

    params = {
        "w1": init(ks[0], (F, H1)),   "b1": init(ks[1], (1, H1)),
        "w2": init(ks[2], (H1, H2)),  "b2": init(ks[3], (1, H2)),
        "wfc": init(ks[4], (H2, 1)),  "bfc": init(ks[5], (1, 1)),
        "wir": init(ks[6], (H2, Hg)), "wiz": init(ks[7], (H2, Hg)),
        "win": init(ks[8], (H2, Hg)),
        "whr": init(ks[9], (Hg, Hg)), "whz": init(ks[10], (Hg, Hg)),
        "whn": init(ks[11], (Hg, Hg)),
        "br": init(ks[12], (1, Hg)),  "bz": init(ks[13], (1, Hg)),
        "bin": init(ks[14], (1, Hg)), "bhn": init(ks[15], (1, Hg)),
        "wout": init(ks[16], (Hg, 1)), "bout": init(ks[17], (1, 1)),
        "pe": positional_encoding(L, H2),
    }

    x = jax.random.normal(ks[18], (B, F), dtype=jnp.float32)

    out = dynamic_deepsurv(x, params, L)
    jax.block_until_ready(out)

    ref = _reference(x, params, L)
    assert out["risk_pred"].shape == (B, 1)
    assert out["event_seq"].shape == (B, L)
    assert jnp.allclose(out["risk_pred"], ref["risk_pred"], atol=2e-5)
    assert jnp.allclose(out["event_seq"], ref["event_seq"], atol=2e-5)

    print("KERNEL_OK")
</pallas_src>

<mosaic_0001>
module attributes {stable_mosaic.version = 11 : i64} {
  func.func @ddsurv_kernel(%arg0: i32, %arg1: memref<8x16xf32, #tpu.memory_space<vmem>>, %arg2: memref<16x32xf32, #tpu.memory_space<vmem>>, %arg3: memref<1x32xf32, #tpu.memory_space<vmem>>, %arg4: memref<32x32xf32, #tpu.memory_space<vmem>>, %arg5: memref<1x32xf32, #tpu.memory_space<vmem>>, %arg6: memref<32x97xf32, #tpu.memory_space<vmem>>, %arg7: memref<1x1xf32, #tpu.memory_space<vmem>>, %arg8: memref<8x96xf32, #tpu.memory_space<vmem>>, %arg9: memref<32x96xf32, #tpu.memory_space<vmem>>, %arg10: memref<1x32xf32, #tpu.memory_space<vmem>>, %arg11: memref<1x32xf32, #tpu.memory_space<vmem>>, %arg12: memref<1x1xf32, #tpu.memory_space<vmem>>, %arg13: memref<8x1xf32, #tpu.memory_space<vmem>>, %arg14: memref<8x8xf32, #tpu.memory_space<vmem>>, %arg15: memref<8x8x96xf32, #tpu.memory_space<vmem>>, %arg16: memref<8x8x32xf32, #tpu.memory_space<vmem>>) attributes {dimension_semantics = [#tpu.dimension_semantics<parallel>], iteration_bounds = array<i64: 1>, scalar_prefetch = 0 : i64, scratch_operands = 2 : i64, tpu.core_type = #tpu.core_type<tc>, window_params = [{transform_indices = @transform_0, window_bounds = array<i64: 8, 16>}, {pipeline_mode = #tpu.pipeline_mode<synchronous>, transform_indices = @transform_1, window_bounds = array<i64: 16, 32>}, {pipeline_mode = #tpu.pipeline_mode<synchronous>, transform_indices = @transform_2, window_bounds = array<i64: 1, 32>}, {pipeline_mode = #tpu.pipeline_mode<synchronous>, transform_indices = @transform_3, window_bounds = array<i64: 32, 32>}, {pipeline_mode = #tpu.pipeline_mode<synchronous>, transform_indices = @transform_4, window_bounds = array<i64: 1, 32>}, {pipeline_mode = #tpu.pipeline_mode<synchronous>, transform_indices = @transform_5, window_bounds = array<i64: 32, 97>}, {pipeline_mode = #tpu.pipeline_mode<synchronous>, transform_indices = @transform_6, window_bounds = array<i64: 1, 1>}, {pipeline_mode = #tpu.pipeline_mode<synchronous>, transform_indices = @transform_7, window_bounds = array<i64: 8, 96>}, {pipeline_mode = #tpu.pipeline_mode<synchronous>, transform_indices = @transform_8, window_bounds = array<i64: 32, 96>}, {pipeline_mode = #tpu.pipeline_mode<synchronous>, transform_indices = @transform_9, window_bounds = array<i64: 1, 32>}, {pipeline_mode = #tpu.pipeline_mode<synchronous>, transform_indices = @transform_10, window_bounds = array<i64: 1, 32>}, {pipeline_mode = #tpu.pipeline_mode<synchronous>, transform_indices = @transform_11, window_bounds = array<i64: 1, 1>}, {transform_indices = @transform_12, window_bounds = array<i64: 8, 1>}, {transform_indices = @transform_13, window_bounds = array<i64: 8, 8>}]} {
    %c0 = arith.constant 0 : index
    %c0_0 = arith.constant 0 : index
    %0 = vector.load %arg1[%c0, %c0_0] : memref<8x16xf32, #tpu.memory_space<vmem>>, vector<8x16xf32>
    %c0_1 = arith.constant 0 : index
    %c0_2 = arith.constant 0 : index
    %1 = vector.load %arg2[%c0_1, %c0_2] : memref<16x32xf32, #tpu.memory_space<vmem>>, vector<16x32xf32>
    %cst = arith.constant dense<0.000000e+00> : vector<8x32xf32>
    %2 = tpu.matmul %0, %1, %cst {dimension_numbers = #tpu.dot_dimension_numbers<[1], [0], [0], [1], [0, 0, 1, 1], [], []>} : vector<8x16xf32>, vector<16x32xf32>, vector<8x32xf32> -> vector<8x32xf32>
    %c0_3 = arith.constant 0 : index
    %c0_4 = arith.constant 0 : index
    %3 = vector.load %arg3[%c0_3, %c0_4] : memref<1x32xf32, #tpu.memory_space<vmem>>, vector<1x32xf32>
    %4 = vector.broadcast %3 : vector<1x32xf32> to vector<8x32xf32>
    %5 = arith.addf %2, %4 : vector<8x32xf32>
    %cst_5 = arith.constant 0.000000e+00 : f32
    %6 = vector.broadcast %cst_5 : f32 to vector<8x32xf32>
    %7 = arith.maximumf %5, %6 : vector<8x32xf32>
    %c0_6 = arith.constant 0 : index
    %c0_7 = arith.constant 0 : index
    %8 = vector.load %arg4[%c0_6, %c0_7] : memref<32x32xf32, #tpu.memory_space<vmem>>, vector<32x32xf32>
    %cst_8 = arith.constant dense<0.000000e+00> : vector<8x32xf32>
    %9 = tpu.matmul %7, %8, %cst_8 {dimension_numbers = #tpu.dot_dimension_numbers<[1], [0], [0], [1], [0, 0, 1, 1], [], []>} : vector<8x32xf32>, vector<32x32xf32>, vector<8x32xf32> -> vector<8x32xf32>
    %c0_9 = arith.constant 0 : index
    %c0_10 = arith.constant 0 : index
    %10 = vector.load %arg5[%c0_9, %c0_10] : memref<1x32xf32, #tpu.memory_space<vmem>>, vector<1x32xf32>
    %11 = vector.broadcast %10 : vector<1x32xf32> to vector<8x32xf32>
    %12 = arith.addf %9, %11 : vector<8x32xf32>
    %cst_11 = arith.constant 0.000000e+00 : f32
    %13 = vector.broadcast %cst_11 : f32 to vector<8x32xf32>
    %14 = arith.maximumf %12, %13 : vector<8x32xf32>
    %c0_12 = arith.constant 0 : index
    %c0_13 = arith.constant 0 : index
    %15 = vector.load %arg6[%c0_12, %c0_13] : memref<32x97xf32, #tpu.memory_space<vmem>>, vector<32x97xf32>
    %cst_14 = arith.constant dense<0.000000e+00> : vector<8x97xf32>
    %16 = tpu.matmul %14, %15, %cst_14 {dimension_numbers = #tpu.dot_dimension_numbers<[1], [0], [0], [1], [0, 0, 1, 1], [], []>} : vector<8x32xf32>, vector<32x97xf32>, vector<8x97xf32> -> vector<8x97xf32>
    %17 = vector.extract_strided_slice %16 {offsets = [0, 96], sizes = [8, 1], strides = [1, 1]} : vector<8x97xf32> to vector<8x1xf32>
    %c0_15 = arith.constant 0 : index
    %c0_16 = arith.constant 0 : index
    %18 = vector.load %arg7[%c0_15, %c0_16] : memref<1x1xf32, #tpu.memory_space<vmem>>, vector<1x1xf32>
    %19 = vector.broadcast %18 : vector<1x1xf32> to vector<8x1xf32>
    %20 = arith.addf %17, %19 : vector<8x1xf32>
    %cst_17 = arith.constant 2.000000e+01 : f32
    %21 = vector.broadcast %cst_17 : f32 to vector<8x1xf32>
    %22 = arith.cmpf ogt, %20, %21 : vector<8x1xf32>
    %cst_18 = arith.constant 2.000000e+01 : f32
    %23 = vector.broadcast %cst_18 : f32 to vector<8x1xf32>
    %24 = arith.minimumf %20, %23 : vector<8x1xf32>
    %25 = math.exp %24 : vector<8x1xf32>
    %26 = math.log1p %25 : vector<8x1xf32>
    %27 = arith.select %22, %20, %26 : vector<8x1xi1>, vector<8x1xf32>
    %c0_19 = arith.constant 0 : index
    %c0_20 = arith.constant 0 : index
    %28 = vector.load %arg13[%c0_19, %c0_20] : memref<8x1xf32, #tpu.memory_space<vmem>>, vector<8x1xf32>
    tpu.vector_store %arg13[%c0_19, %c0_20], %27 {strides = array<i32>} : memref<8x1xf32, #tpu.memory_space<vmem>>, vector<8x1xf32>,
    %29 = vector.extract_strided_slice %16 {offsets = [0, 0], sizes = [8, 96], strides = [1, 1]} : vector<8x97xf32> to vector<8x96xf32>
    %30 = vector.shape_cast %29 : vector<8x96xf32> to vector<1x8x96xf32>
    %c0_21 = arith.constant 0 : index
    %c0_22 = arith.constant 0 : index
    %31 = vector.load %arg8[%c0_21, %c0_22] : memref<8x96xf32, #tpu.memory_space<vmem>>, vector<8x96xf32>
    %32 = vector.shape_cast %31 : vector<8x96xf32> to vector<8x1x96xf32>
    %33 = vector.broadcast %30 : vector<1x8x96xf32> to vector<8x8x96xf32>
    %34 = vector.broadcast %32 : vector<8x1x96xf32> to vector<8x8x96xf32>
    %35 = arith.addf %33, %34 : vector<8x8x96xf32>
    %c0_23 = arith.constant 0 : index
    %c0_24 = arith.constant 0 : index
    %c0_25 = arith.constant 0 : index
    %36 = vector.load %arg15[%c0_23, %c0_24, %c0_25] : memref<8x8x96xf32, #tpu.memory_space<vmem>>, vector<8x8x96xf32>
    tpu.vector_store %arg15[%c0_23, %c0_24, %c0_25], %35 {strides = array<i32>} : memref<8x8x96xf32, #tpu.memory_space<vmem>>, vector<8x8x96xf32>,
    %c0_26 = arith.constant 0 : index
    %c0_27 = arith.constant 0 : index
    %37 = vector.load %arg10[%c0_26, %c0_27] : memref<1x32xf32, #tpu.memory_space<vmem>>, vector<1x32xf32>
    %38 = vector.shape_cast %37 : vector<1x32xf32> to vector<1x32xf32>
    %39 = vector.broadcast %38 : vector<1x32xf32> to vector<8x32xf32>
    %c0_28 = arith.constant 0 : index
    %c0_29 = arith.constant 0 : index
    %40 = vector.load %arg9[%c0_28, %c0_29] : memref<32x96xf32, #tpu.memory_space<vmem>>, vector<32x96xf32>
    %cst_30 = arith.constant 0.000000e+00 : f32
    %41 = vector.broadcast %cst_30 : f32 to vector<8x32xf32>
    %c0_31 = arith.constant 0 : index
    %c0_32 = arith.constant 0 : index
    %c0_33 = arith.constant 0 : index
    %42 = vector.load %arg15[%c0_31, %c0_32, %c0_33] : memref<8x8x96xf32, #tpu.memory_space<vmem>>, vector<1x8x96xf32>
    %43 = vector.shape_cast %42 : vector<1x8x96xf32> to vector<8x96xf32>
    %cst_34 = arith.constant dense<0.000000e+00> : vector<8x96xf32>
    %44 = tpu.matmul %41, %40, %cst_34 {dimension_numbers = #tpu.dot_dimension_numbers<[1], [0], [0], [1], [0, 0, 1, 1], [], []>} : vector<8x32xf32>, vector<32x96xf32>, vector<8x96xf32> -> vector<8x96xf32>
    %45 = vector.extract_strided_slice %43 {offsets = [0, 0], sizes = [8, 32], strides = [1, 1]} : vector<8x96xf32> to vector<8x32xf32>
    %46 = vector.extract_strided_slice %44 {offsets = [0, 0], sizes = [8, 32], strides = [1, 1]} : vector<8x96xf32> to vector<8x32xf32>
    %47 = arith.addf %45, %46 : vector<8x32xf32>
    %48 = arith.negf %47 : vector<8x32xf32>
    %49 = math.exp %48 : vector<8x32xf32>
    %cst_35 = arith.constant 1.000000e+00 : f32
    %50 = vector.broadcast %cst_35 : f32 to vector<8x32xf32>
    %51 = arith.addf %50, %49 : vector<8x32xf32>
    %52 = arith.divf %50, %51 : vector<8x32xf32>
    %53 = vector.extract_strided_slice %43 {offsets = [0, 32], sizes = [8, 32], strides = [1, 1]} : vector<8x96xf32> to vector<8x32xf32>
    %54 = vector.extract_strided_slice %44 {offsets = [0, 32], sizes = [8, 32], strides = [1, 1]} : vector<8x96xf32> to vector<8x32xf32>
    %55 = arith.addf %53, %54 : vector<8x32xf32>
    %56 = arith.negf %55 : vector<8x32xf32>
    %57 = math.exp %56 : vector<8x32xf32>
    %cst_36 = arith.constant 1.000000e+00 : f32
    %58 = vector.broadcast %cst_36 : f32 to vector<8x32xf32>
    %59 = arith.addf %58, %57 : vector<8x32xf32>
    %60 = arith.divf %58, %59 : vector<8x32xf32>
    %61 = vector.extract_strided_slice %43 {offsets = [0, 64], sizes = [8, 32], strides = [1, 1]} : vector<8x96xf32> to vector<8x32xf32>
    %62 = vector.extract_strided_slice %44 {offsets = [0, 64], sizes = [8, 32], strides = [1, 1]} : vector<8x96xf32> to vector<8x32xf32>
    %63 = arith.addf %62, %39 : vector<8x32xf32>
    %64 = arith.mulf %52, %63 : vector<8x32xf32>
    %65 = arith.addf %61, %64 : vector<8x32xf32>
    %66 = math.tanh %65 : vector<8x32xf32>
    %cst_37 = arith.constant 1.000000e+00 : f32
    %67 = vector.broadcast %cst_37 : f32 to vector<8x32xf32>
    %68 = arith.subf %67, %60 : vector<8x32xf32>
    %69 = arith.mulf %68, %66 : vector<8x32xf32>
    %70 = arith.mulf %60, %41 : vector<8x32xf32>
    %71 = arith.addf %69, %70 : vector<8x32xf32>
    %c0_38 = arith.constant 0 : index
    %c0_39 = arith.constant 0 : index
    %c0_40 = arith.constant 0 : index
    %72 = vector.load %arg16[%c0_38, %c0_39, %c0_40] : memref<8x8x32xf32, #tpu.memory_space<vmem>>, vector<1x8x32xf32>
    %73 = vector.shape_cast %72 : vector<1x8x32xf32> to vector<8x32xf32>
    %74 = vector.shape_cast %71 : vector<8x32xf32> to vector<1x8x32xf32>
    tpu.vector_store %arg16[%c0_38, %c0_39, %c0_40], %74 {strides = array<i32>} : memref<8x8x32xf32, #tpu.memory_space<vmem>>, vector<1x8x32xf32>,
    %c1 = arith.constant 1 : index
    %c0_41 = arith.constant 0 : index
    %c0_42 = arith.constant 0 : index
    %75 = vector.load %arg15[%c1, %c0_41, %c0_42] : memref<8x8x96xf32, #tpu.memory_space<vmem>>, vector<1x8x96xf32>
    %76 = vector.shape_cast %75 : vector<1x8x96xf32> to vector<8x96xf32>
    %cst_43 = arith.constant dense<0.000000e+00> : vector<8x96xf32>
    %77 = tpu.matmul %71, %40, %cst_43 {dimension_numbers = #tpu.dot_dimension_numbers<[1], [0], [0], [1], [0, 0, 1, 1], [], []>} : vector<8x32xf32>, vector<32x96xf32>, vector<8x96xf32> -> vector<8x96xf32>
    %78 = vector.extract_strided_slice %76 {offsets = [0, 0], sizes = [8, 32], strides = [1, 1]} : vector<8x96xf32> to vector<8x32xf32>
    %79 = vector.extract_strided_slice %77 {offsets = [0, 0], sizes = [8, 32], strides = [1, 1]} : vector<8x96xf32> to vector<8x32xf32>
    %80 = arith.addf %78, %79 : vector<8x32xf32>
    %81 = arith.negf %80 : vector<8x32xf32>
    %82 = math.exp %81 : vector<8x32xf32>
    %cst_44 = arith.constant 1.000000e+00 : f32
    %83 = vector.broadcast %cst_44 : f32 to vector<8x32xf32>
    %84 = arith.addf %83, %82 : vector<8x32xf32>
    %85 = arith.divf %83, %84 : vector<8x32xf32>
    %86 = vector.extract_strided_slice %76 {offsets = [0, 32], sizes = [8, 32], strides = [1, 1]} : vector<8x96xf32> to vector<8x32xf32>
    %87 = vector.extract_strided_slice %77 {offsets = [0, 32], sizes = [8, 32], strides = [1, 1]} : vector<8x96xf32> to vector<8x32xf32>
    %88 = arith.addf %86, %87 : vector<8x32xf32>
    %89 = arith.negf %88 : vector<8x32xf32>
    %90 = math.exp %89 : vector<8x32xf32>
    %cst_45 = arith.constant 1.000000e+00 : f32
    %91 = vector.broadcast %cst_45 : f32 to vector<8x32xf32>
    %92 = arith.addf %91, %90 : vector<8x32xf32>
    %93 = arith.divf %91, %92 : vector<8x32xf32>
    %94 = vector.extract_strided_slice %76 {offsets = [0, 64], sizes = [8, 32], strides = [1, 1]} : vector<8x96xf32> to vector<8x32xf32>
    %95 = vector.extract_strided_slice %77 {offsets = [0, 64], sizes = [8, 32], strides = [1, 1]} : vector<8x96xf32> to vector<8x32xf32>
    %96 = arith.addf %95, %39 : vector<8x32xf32>
    %97 = arith.mulf %85, %96 : vector<8x32xf32>
    %98 = arith.addf %94, %97 : vector<8x32xf32>
    %99 = math.tanh %98 : vector<8x32xf32>
    %cst_46 = arith.constant 1.000000e+00 : f32
    %100 = vector.broadcast %cst_46 : f32 to vector<8x32xf32>
    %101 = arith.subf %100, %93 : vector<8x32xf32>
    %102 = arith.mulf %101, %99 : vector<8x32xf32>
    %103 = arith.mulf %93, %71 : vector<8x32xf32>
    %104 = arith.addf %102, %103 : vector<8x32xf32>
    %c1_47 = arith.constant 1 : index
    %c0_48 = arith.constant 0 : index
    %c0_49 = arith.constant 0 : index
    %105 = vector.load %arg16[%c1_47, %c0_48, %c0_49] : memref<8x8x32xf32, #tpu.memory_space<vmem>>, vector<1x8x32xf32>
    %106 = vector.shape_cast %105 : vector<1x8x32xf32> to vector<8x32xf32>
    %107 = vector.shape_cast %104 : vector<8x32xf32> to vector<1x8x32xf32>
    tpu.vector_store %arg16[%c1_47, %c0_48, %c0_49], %107 {strides = array<i32>} : memref<8x8x32xf32, #tpu.memory_space<vmem>>, vector<1x8x32xf32>,
    %c2 = arith.constant 2 : index
    %c0_50 = arith.constant 0 : index
    %c0_51 = arith.constant 0 : index
    %108 = vector.load %arg15[%c2, %c0_50, %c0_51] : memref<8x8x96xf32, #tpu.memory_space<vmem>>, vector<1x8x96xf32>
    %109 = vector.shape_cast %108 : vector<1x8x96xf32> to vector<8x96xf32>
    %cst_52 = arith.constant dense<0.000000e+00> : vector<8x96xf32>
    %110 = tpu.matmul %104, %40, %cst_52 {dimension_numbers = #tpu.dot_dimension_numbers<[1], [0], [0], [1], [0, 0, 1, 1], [], []>} : vector<8x32xf32>, vector<32x96xf32>, vector<8x96xf32> -> vector<8x96xf32>
    %111 = vector.extract_strided_slice %109 {offsets = [0, 0], sizes = [8, 32], strides = [1, 1]} : vector<8x96xf32> to vector<8x32xf32>
    %112 = vector.extract_strided_slice %110 {offsets = [0, 0], sizes = [8, 32], strides = [1, 1]} : vector<8x96xf32> to vector<8x32xf32>
    %113 = arith.addf %111, %112 : vector<8x32xf32>
    %114 = arith.negf %113 : vector<8x32xf32>
    %115 = math.exp %114 : vector<8x32xf32>
    %cst_53 = arith.constant 1.000000e+00 : f32
    %116 = vector.broadcast %cst_53 : f32 to vector<8x32xf32>
    %117 = arith.addf %116, %115 : vector<8x32xf32>
    %118 = arith.divf %116, %117 : vector<8x32xf32>
    %119 = vector.extract_strided_slice %109 {offsets = [0, 32], sizes = [8, 32], strides = [1, 1]} : vector<8x96xf32> to vector<8x32xf32>
    %120 = vector.extract_strided_slice %110 {offsets = [0, 32], sizes = [8, 32], strides = [1, 1]} : vector<8x96xf32> to vector<8x32xf32>
    %121 = arith.addf %119, %120 : vector<8x32xf32>
    %122 = arith.negf %121 : vector<8x32xf32>
    %123 = math.exp %122 : vector<8x32xf32>
    %cst_54 = arith.constant 1.000000e+00 : f32
    %124 = vector.broadcast %cst_54 : f32 to vector<8x32xf32>
    %125 = arith.addf %124, %123 : vector<8x32xf32>
    %126 = arith.divf %124, %125 : vector<8x32xf32>
    %127 = vector.extract_strided_slice %109 {offsets = [0, 64], sizes = [8, 32], strides = [1, 1]} : vector<8x96xf32> to vector<8x32xf32>
    %128 = vector.extract_strided_slice %110 {offsets = [0, 64], sizes = [8, 32], strides = [1, 1]} : vector<8x96xf32> to vector<8x32xf32>
    %129 = arith.addf %128, %39 : vector<8x32xf32>
    %130 = arith.mulf %118, %129 : vector<8x32xf32>
    %131 = arith.addf %127, %130 : vector<8x32xf32>
    %132 = math.tanh %131 : vector<8x32xf32>
    %cst_55 = arith.constant 1.000000e+00 : f32
    %133 = vector.broadcast %cst_55 : f32 to vector<8x32xf32>
    %134 = arith.subf %133, %126 : vector<8x32xf32>
    %135 = arith.mulf %134, %132 : vector<8x32xf32>
    %136 = arith.mulf %126, %104 : vector<8x32xf32>
    %137 = arith.addf %135, %136 : vector<8x32xf32>
    %c2_56 = arith.constant 2 : index
    %c0_57 = arith.constant 0 : index
    %c0_58 = arith.constant 0 : index
    %138 = vector.load %arg16[%c2_56, %c0_57, %c0_58] : memref<8x8x32xf32, #tpu.memory_space<vmem>>, vector<1x8x32xf32>
    %139 = vector.shape_cast %138 : vector<1x8x32xf32> to vector<8x32xf32>
    %140 = vector.shape_cast %137 : vector<8x32xf32> to vector<1x8x32xf32>
    tpu.vector_store %arg16[%c2_56, %c0_57, %c0_58], %140 {strides = array<i32>} : memref<8x8x32xf32, #tpu.memory_space<vmem>>, vector<1x8x32xf32>,
    %c3 = arith.constant 3 : index
    %c0_59 = arith.constant 0 : index
    %c0_60 = arith.constant 0 : index
    %141 = vector.load %arg15[%c3, %c0_59, %c0_60] : memref<8x8x96xf32, #tpu.memory_space<vmem>>, vector<1x8x96xf32>
    %142 = vector.shape_cast %141 : vector<1x8x96xf32> to vector<8x96xf32>
    %cst_61 = arith.constant dense<0.000000e+00> : vector<8x96xf32>
    %143 = tpu.matmul %137, %40, %cst_61 {dimension_numbers = #tpu.dot_dimension_numbers<[1], [0], [0], [1], [0, 0, 1, 1], [], []>} : vector<8x32xf32>, vector<32x96xf32>, vector<8x96xf32> -> vector<8x96xf32>
    %144 = vector.extract_strided_slice %142 {offsets = [0, 0], sizes = [8, 32], strides = [1, 1]} : vector<8x96xf32> to vector<8x32xf32>
    %145 = vector.extract_strided_slice %143 {offsets = [0, 0], sizes = [8, 32], strides = [1, 1]} : vector<8x96xf32> to vector<8x32xf32>
    %146 = arith.addf %144, %145 : vector<8x32xf32>
    %147 = arith.negf %146 : vector<8x32xf32>
    %148 = math.exp %147 : vector<8x32xf32>
    %cst_62 = arith.constant 1.000000e+00 : f32
    %149 = vector.broadcast %cst_62 : f32 to vector<8x32xf32>
    %150 = arith.addf %149, %148 : vector<8x32xf32>
    %151 = arith.divf %149, %150 : vector<8x32xf32>
    %152 = vector.extract_strided_slice %142 {offsets = [0, 32], sizes = [8, 32], strides = [1, 1]} : vector<8x96xf32> to vector<8x32xf32>
    %153 = vector.extract_strided_slice %143 {offsets = [0, 32], sizes = [8, 32], strides = [1, 1]} : vector<8x96xf32> to vector<8x32xf32>
    %154 = arith.addf %152, %153 : vector<8x32xf32>
    %155 = arith.negf %154 : vector<8x32xf32>
    %156 = math.exp %155 : vector<8x32xf32>
    %cst_63 = arith.constant 1.000000e+00 : f32
    %157 = vector.broadcast %cst_63 : f32 to vector<8x32xf32>
    %158 = arith.addf %157, %156 : vector<8x32xf32>
    %159 = arith.divf %157, %158 : vector<8x32xf32>
    %160 = vector.extract_strided_slice %142 {offsets = [0, 64], sizes = [8, 32], strides = [1, 1]} : vector<8x96xf32> to vector<8x32xf32>
    %161 = vector.extract_strided_slice %143 {offsets = [0, 64], sizes = [8, 32], strides = [1, 1]} : vector<8x96xf32> to vector<8x32xf32>
    %162 = arith.addf %161, %39 : vector<8x32xf32>
    %163 = arith.mulf %151, %162 : vector<8x32xf32>
    %164 = arith.addf %160, %163 : vector<8x32xf32>
    %165 = math.tanh %164 : vector<8x32xf32>
    %cst_64 = arith.constant 1.000000e+00 : f32
    %166 = vector.broadcast %cst_64 : f32 to vector<8x32xf32>
    %167 = arith.subf %166, %159 : vector<8x32xf32>
    %168 = arith.mulf %167, %165 : vector<8x32xf32>
    %169 = arith.mulf %159, %137 : vector<8x32xf32>
    %170 = arith.addf %168, %169 : vector<8x32xf32>
    %c3_65 = arith.constant 3 : index
    %c0_66 = arith.constant 0 : index
    %c0_67 = arith.constant 0 : index
    %171 = vector.load %arg16[%c3_65, %c0_66, %c0_67] : memref<8x8x32xf32, #tpu.memory_space<vmem>>, vector<1x8x32xf32>
    %172 = vector.shape_cast %171 : vector<1x8x32xf32> to vector<8x32xf32>
    %173 = vector.shape_cast %170 : vector<8x32xf32> to vector<1x8x32xf32>
    tpu.vector_store %arg16[%c3_65, %c0_66, %c0_67], %173 {strides = array<i32>} : memref<8x8x32xf32, #tpu.memory_space<vmem>>, vector<1x8x32xf32>,
    %c4 = arith.constant 4 : index
    %c0_68 = arith.constant 0 : index
    %c0_69 = arith.constant 0 : index
    %174 = vector.load %arg15[%c4, %c0_68, %c0_69] : memref<8x8x96xf32, #tpu.memory_space<vmem>>, vector<1x8x96xf32>
    %175 = vector.shape_cast %174 : vector<1x8x96xf32> to vector<8x96xf32>
    %cst_70 = arith.constant dense<0.000000e+00> : vector<8x96xf32>
    %176 = tpu.matmul %170, %40, %cst_70 {dimension_numbers = #tpu.dot_dimension_numbers<[1], [0], [0], [1], [0, 0, 1, 1], [], []>} : vector<8x32xf32>, vector<32x96xf32>, vector<8x96xf32> -> vector<8x96xf32>
    %177 = vector.extract_strided_slice %175 {offsets = [0, 0], sizes = [8, 32], strides = [1, 1]} : vector<8x96xf32> to vector<8x32xf32>
    %178 = vector.extract_strided_slice %176 {offsets = [0, 0], sizes = [8, 32], strides = [1, 1]} : vector<8x96xf32> to vector<8x32xf32>
    %179 = arith.addf %177, %178 : vector<8x32xf32>
    %180 = arith.negf %179 : vector<8x32xf32>
    %181 = math.exp %180 : vector<8x32xf32>
    %cst_71 = arith.constant 1.000000e+00 : f32
    %182 = vector.broadcast %cst_71 : f32 to vector<8x32xf32>
    %183 = arith.addf %182, %181 : vector<8x32xf32>
    %184 = arith.divf %182, %183 : vector<8x32xf32>
    %185 = vector.extract_strided_slice %175 {offsets = [0, 32], sizes = [8, 32], strides = [1, 1]} : vector<8x96xf32> to vector<8x32xf32>
    %186 = vector.extract_strided_slice %176 {offsets = [0, 32], sizes = [8, 32], strides = [1, 1]} : vector<8x96xf32> to vector<8x32xf32>
    %187 = arith.addf %185, %186 : vector<8x32xf32>
    %188 = arith.negf %187 : vector<8x32xf32>
    %189 = math.exp %188 : vector<8x32xf32>
    %cst_72 = arith.constant 1.000000e+00 : f32
    %190 = vector.broadcast %cst_72 : f32 to vector<8x32xf32>
    %191 = arith.addf %190, %189 : vector<8x32xf32>
    %192 = arith.divf %190, %191 : vector<8x32xf32>
    %193 = vector.extract_strided_slice %175 {offsets = [0, 64], sizes = [8, 32], strides = [1, 1]} : vector<8x96xf32> to vector<8x32xf32>
    %194 = vector.extract_strided_slice %176 {offsets = [0, 64], sizes = [8, 32], strides = [1, 1]} : vector<8x96xf32> to vector<8x32xf32>
    %195 = arith.addf %194, %39 : vector<8x32xf32>
    %196 = arith.mulf %184, %195 : vector<8x32xf32>
    %197 = arith.addf %193, %196 : vector<8x32xf32>
    %198 = math.tanh %197 : vector<8x32xf32>
    %cst_73 = arith.constant 1.000000e+00 : f32
    %199 = vector.broadcast %cst_73 : f32 to vector<8x32xf32>
    %200 = arith.subf %199, %192 : vector<8x32xf32>
    %201 = arith.mulf %200, %198 : vector<8x32xf32>
    %202 = arith.mulf %192, %170 : vector<8x32xf32>
    %203 = arith.addf %201, %202 : vector<8x32xf32>
    %c4_74 = arith.constant 4 : index
    %c0_75 = arith.constant 0 : index
    %c0_76 = arith.constant 0 : index
    %204 = vector.load %arg16[%c4_74, %c0_75, %c0_76] : memref<8x8x32xf32, #tpu.memory_space<vmem>>, vector<1x8x32xf32>
    %205 = vector.shape_cast %204 : vector<1x8x32xf32> to vector<8x32xf32>
    %206 = vector.shape_cast %203 : vector<8x32xf32> to vector<1x8x32xf32>
    tpu.vector_store %arg16[%c4_74, %c0_75, %c0_76], %206 {strides = array<i32>} : memref<8x8x32xf32, #tpu.memory_space<vmem>>, vector<1x8x32xf32>,
    %c5 = arith.constant 5 : index
    %c0_77 = arith.constant 0 : index
    %c0_78 = arith.constant 0 : index
    %207 = vector.load %arg15[%c5, %c0_77, %c0_78] : memref<8x8x96xf32, #tpu.memory_space<vmem>>, vector<1x8x96xf32>
    %208 = vector.shape_cast %207 : vector<1x8x96xf32> to vector<8x96xf32>
    %cst_79 = arith.constant dense<0.000000e+00> : vector<8x96xf32>
    %209 = tpu.matmul %203, %40, %cst_79 {dimension_numbers = #tpu.dot_dimension_numbers<[1], [0], [0], [1], [0, 0, 1, 1], [], []>} : vector<8x32xf32>, vector<32x96xf32>, vector<8x96xf32> -> vector<8x96xf32>
    %210 = vector.extract_strided_slice %208 {offsets = [0, 0], sizes = [8, 32], strides = [1, 1]} : vector<8x96xf32> to vector<8x32xf32>
    %211 = vector.extract_strided_slice %209 {offsets = [0, 0], sizes = [8, 32], strides = [1, 1]} : vector<8x96xf32> to vector<8x32xf32>
    %212 = arith.addf %210, %211 : vector<8x32xf32>
    %213 = arith.negf %212 : vector<8x32xf32>
    %214 = math.exp %213 : vector<8x32xf32>
    %cst_80 = arith.constant 1.000000e+00 : f32
    %215 = vector.broadcast %cst_80 : f32 to vector<8x32xf32>
    %216 = arith.addf %215, %214 : vector<8x32xf32>
    %217 = arith.divf %215, %216 : vector<8x32xf32>
    %218 = vector.extract_strided_slice %208 {offsets = [0, 32], sizes = [8, 32], strides = [1, 1]} : vector<8x96xf32> to vector<8x32xf32>
    %219 = vector.extract_strided_slice %209 {offsets = [0, 32], sizes = [8, 32], strides = [1, 1]} : vector<8x96xf32> to vector<8x32xf32>
    %220 = arith.addf %218, %219 : vector<8x32xf32>
    %221 = arith.negf %220 : vector<8x32xf32>
    %222 = math.exp %221 : vector<8x32xf32>
    %cst_81 = arith.constant 1.000000e+00 : f32
    %223 = vector.broadcast %cst_81 : f32 to vector<8x32xf32>
    %224 = arith.addf %223, %222 : vector<8x32xf32>
    %225 = arith.divf %223, %224 : vector<8x32xf32>
    %226 = vector.extract_strided_slice %208 {offsets = [0, 64], sizes = [8, 32], strides = [1, 1]} : vector<8x96xf32> to vector<8x32xf32>
    %227 = vector.extract_strided_slice %209 {offsets = [0, 64], sizes = [8, 32], strides = [1, 1]} : vector<8x96xf32> to vector<8x32xf32>
    %228 = arith.addf %227, %39 : vector<8x32xf32>
    %229 = arith.mulf %217, %228 : vector<8x32xf32>
    %230 = arith.addf %226, %229 : vector<8x32xf32>
    %231 = math.tanh %230 : vector<8x32xf32>
    %cst_82 = arith.constant 1.000000e+00 : f32
    %232 = vector.broadcast %cst_82 : f32 to vector<8x32xf32>
    %233 = arith.subf %232, %225 : vector<8x32xf32>
    %234 = arith.mulf %233, %231 : vector<8x32xf32>
    %235 = arith.mulf %225, %203 : vector<8x32xf32>
    %236 = arith.addf %234, %235 : vector<8x32xf32>
    %c5_83 = arith.constant 5 : index
    %c0_84 = arith.constant 0 : index
    %c0_85 = arith.constant 0 : index
    %237 = vector.load %arg16[%c5_83, %c0_84, %c0_85] : memref<8x8x32xf32, #tpu.memory_space<vmem>>, vector<1x8x32xf32>
    %238 = vector.shape_cast %237 : vector<1x8x32xf32> to vector<8x32xf32>
    %239 = vector.shape_cast %236 : vector<8x32xf32> to vector<1x8x32xf32>
    tpu.vector_store %arg16[%c5_83, %c0_84, %c0_85], %239 {strides = array<i32>} : memref<8x8x32xf32, #tpu.memory_space<vmem>>, vector<1x8x32xf32>,
    %c6 = arith.constant 6 : index
    %c0_86 = arith.constant 0 : index
    %c0_87 = arith.constant 0 : index
    %240 = vector.load %arg15[%c6, %c0_86, %c0_87] : memref<8x8x96xf32, #tpu.memory_space<vmem>>, vector<1x8x96xf32>
    %241 = vector.shape_cast %240 : vector<1x8x96xf32> to vector<8x96xf32>
    %cst_88 = arith.constant dense<0.000000e+00> : vector<8x96xf32>
    %242 = tpu.matmul %236, %40, %cst_88 {dimension_numbers = #tpu.dot_dimension_numbers<[1], [0], [0], [1], [0, 0, 1, 1], [], []>} : vector<8x32xf32>, vector<32x96xf32>, vector<8x96xf32> -> vector<8x96xf32>
    %243 = vector.extract_strided_slice %241 {offsets = [0, 0], sizes = [8, 32], strides = [1, 1]} : vector<8x96xf32> to vector<8x32xf32>
    %244 = vector.extract_strided_slice %242 {offsets = [0, 0], sizes = [8, 32], strides = [1, 1]} : vector<8x96xf32> to vector<8x32xf32>
    %245 = arith.addf %243, %244 : vector<8x32xf32>
    %246 = arith.negf %245 : vector<8x32xf32>
    %247 = math.exp %246 : vector<8x32xf32>
    %cst_89 = arith.constant 1.000000e+00 : f32
    %248 = vector.broadcast %cst_89 : f32 to vector<8x32xf32>
    %249 = arith.addf %248, %247 : vector<8x32xf32>
    %250 = arith.divf %248, %249 : vector<8x32xf32>
    %251 = vector.extract_strided_slice %241 {offsets = [0, 32], sizes = [8, 32], strides = [1, 1]} : vector<8x96xf32> to vector<8x32xf32>
    %252 = vector.extract_strided_slice %242 {offsets = [0, 32], sizes = [8, 32], strides = [1, 1]} : vector<8x96xf32> to vector<8x32xf32>
    %253 = arith.addf %251, %252 : vector<8x32xf32>
    %254 = arith.negf %253 : vector<8x32xf32>
    %255 = math.exp %254 : vector<8x32xf32>
    %cst_90 = arith.constant 1.000000e+00 : f32
    %256 = vector.broadcast %cst_90 : f32 to vector<8x32xf32>
    %257 = arith.addf %256, %255 : vector<8x32xf32>
    %258 = arith.divf %256, %257 : vector<8x32xf32>
    %259 = vector.extract_strided_slice %241 {offsets = [0, 64], sizes = [8, 32], strides = [1, 1]} : vector<8x96xf32> to vector<8x32xf32>
    %260 = vector.extract_strided_slice %242 {offsets = [0, 64], sizes = [8, 32], strides = [1, 1]} : vector<8x96xf32> to vector<8x32xf32>
    %261 = arith.addf %260, %39 : vector<8x32xf32>
    %262 = arith.mulf %250, %261 : vector<8x32xf32>
    %263 = arith.addf %259, %262 : vector<8x32xf32>
    %264 = math.tanh %263 : vector<8x32xf32>
    %cst_91 = arith.constant 1.000000e+00 : f32
    %265 = vector.broadcast %cst_91 : f32 to vector<8x32xf32>
    %266 = arith.subf %265, %258 : vector<8x32xf32>
    %267 = arith.mulf %266, %264 : vector<8x32xf32>
    %268 = arith.mulf %258, %236 : vector<8x32xf32>
    %269 = arith.addf %267, %268 : vector<8x32xf32>
    %c6_92 = arith.constant 6 : index
    %c0_93 = arith.constant 0 : index
    %c0_94 = arith.constant 0 : index
    %270 = vector.load %arg16[%c6_92, %c0_93, %c0_94] : memref<8x8x32xf32, #tpu.memory_space<vmem>>, vector<1x8x32xf32>
    %271 = vector.shape_cast %270 : vector<1x8x32xf32> to vector<8x32xf32>
    %272 = vector.shape_cast %269 : vector<8x32xf32> to vector<1x8x32xf32>
    tpu.vector_store %arg16[%c6_92, %c0_93, %c0_94], %272 {strides = array<i32>} : memref<8x8x32xf32, #tpu.memory_space<vmem>>, vector<1x8x32xf32>,
    %c7 = arith.constant 7 : index
    %c0_95 = arith.constant 0 : index
    %c0_96 = arith.constant 0 : index
    %273 = vector.load %arg15[%c7, %c0_95, %c0_96] : memref<8x8x96xf32, #tpu.memory_space<vmem>>, vector<1x8x96xf32>
    %274 = vector.shape_cast %273 : vector<1x8x96xf32> to vector<8x96xf32>
    %cst_97 = arith.constant dense<0.000000e+00> : vector<8x96xf32>
    %275 = tpu.matmul %269, %40, %cst_97 {dimension_numbers = #tpu.dot_dimension_numbers<[1], [0], [0], [1], [0, 0, 1, 1], [], []>} : vector<8x32xf32>, vector<32x96xf32>, vector<8x96xf32> -> vector<8x96xf32>
    %276 = vector.extract_strided_slice %274 {offsets = [0, 0], sizes = [8, 32], strides = [1, 1]} : vector<8x96xf32> to vector<8x32xf32>
    %277 = vector.extract_strided_slice %275 {offsets = [0, 0], sizes = [8, 32], strides = [1, 1]} : vector<8x96xf32> to vector<8x32xf32>
    %278 = arith.addf %276, %277 : vector<8x32xf32>
    %279 = arith.negf %278 : vector<8x32xf32>
    %280 = math.exp %279 : vector<8x32xf32>
    %cst_98 = arith.constant 1.000000e+00 : f32
    %281 = vector.broadcast %cst_98 : f32 to vector<8x32xf32>
    %282 = arith.addf %281, %280 : vector<8x32xf32>
    %283 = arith.divf %281, %282 : vector<8x32xf32>
    %284 = vector.extract_strided_slice %274 {offsets = [0, 32], sizes = [8, 32], strides = [1, 1]} : vector<8x96xf32> to vector<8x32xf32>
    %285 = vector.extract_strided_slice %275 {offsets = [0, 32], sizes = [8, 32], strides = [1, 1]} : vector<8x96xf32> to vector<8x32xf32>
    %286 = arith.addf %284, %285 : vector<8x32xf32>
    %287 = arith.negf %286 : vector<8x32xf32>
    %288 = math.exp %287 : vector<8x32xf32>
    %cst_99 = arith.constant 1.000000e+00 : f32
    %289 = vector.broadcast %cst_99 : f32 to vector<8x32xf32>
    %290 = arith.addf %289, %288 : vector<8x32xf32>
    %291 = arith.divf %289, %290 : vector<8x32xf32>
    %292 = vector.extract_strided_slice %274 {offsets = [0, 64], sizes = [8, 32], strides = [1, 1]} : vector<8x96xf32> to vector<8x32xf32>
    %293 = vector.extract_strided_slice %275 {offsets = [0, 64], sizes = [8, 32], strides = [1, 1]} : vector<8x96xf32> to vector<8x32xf32>
    %294 = arith.addf %293, %39 : vector<8x32xf32>
    %295 = arith.mulf %283, %294 : vector<8x32xf32>
    %296 = arith.addf %292, %295 : vector<8x32xf32>
    %297 = math.tanh %296 : vector<8x32xf32>
    %cst_100 = arith.constant 1.000000e+00 : f32
    %298 = vector.broadcast %cst_100 : f32 to vector<8x32xf32>
    %299 = arith.subf %298, %291 : vector<8x32xf32>
    %300 = arith.mulf %299, %297 : vector<8x32xf32>
    %301 = arith.mulf %291, %269 : vector<8x32xf32>
    %302 = arith.addf %300, %301 : vector<8x32xf32>
    %c7_101 = arith.constant 7 : index
    %c0_102 = arith.constant 0 : index
    %c0_103 = arith.constant 0 : index
    %303 = vector.load %arg16[%c7_101, %c0_102, %c0_103] : memref<8x8x32xf32, #tpu.memory_space<vmem>>, vector<1x8x32xf32>
    %304 = vector.shape_cast %303 : vector<1x8x32xf32> to vector<8x32xf32>
    %305 = vector.shape_cast %302 : vector<8x32xf32> to vector<1x8x32xf32>
    tpu.vector_store %arg16[%c7_101, %c0_102, %c0_103], %305 {strides = array<i32>} : memref<8x8x32xf32, #tpu.memory_space<vmem>>, vector<1x8x32xf32>,
    %c0_104 = arith.constant 0 : index
    %c0_105 = arith.constant 0 : index
    %c0_106 = arith.constant 0 : index
    %306 = vector.load %arg16[%c0_104, %c0_105, %c0_106] : memref<8x8x32xf32, #tpu.memory_space<vmem>>, vector<8x8x32xf32>
    %c0_107 = arith.constant 0 : index
    %c0_108 = arith.constant 0 : index
    %307 = vector.load %arg11[%c0_107, %c0_108] : memref<1x32xf32, #tpu.memory_space<vmem>>, vector<1x32xf32>
    %308 = vector.shape_cast %307 : vector<1x32xf32> to vector<1x1x32xf32>
    %309 = vector.broadcast %308 : vector<1x1x32xf32> to vector<8x8x32xf32>
    %310 = arith.mulf %306, %309 : vector<8x8x32xf32>
    %cst_109 = arith.constant dense<0.000000e+00> : vector<8x8xf32>
    %311 = vector.multi_reduction <add>, %310, %cst_109 [2] : vector<8x8x32xf32> to vector<8x8xf32>
    %c0_110 = arith.constant 0 : index
    %c0_111 = arith.constant 0 : index
    %312 = vector.load %arg12[%c0_110, %c0_111] : memref<1x1xf32, #tpu.memory_space<vmem>>, vector<1x1xf32>
    %313 = vector.broadcast %312 : vector<1x1xf32> to vector<8x8xf32>
    %314 = arith.addf %311, %313 : vector<8x8xf32>
    %315 = arith.negf %314 : vector<8x8xf32>
    %316 = math.exp %315 : vector<8x8xf32>
    %cst_112 = arith.constant 1.000000e+00 : f32
    %317 = vector.broadcast %cst_112 : f32 to vector<8x8xf32>
    %318 = arith.addf %317, %316 : vector<8x8xf32>
    %319 = arith.divf %317, %318 : vector<8x8xf32>
    %c0_113 = arith.constant 0 : index
    %c0_114 = arith.constant 0 : index
    %320 = vector.load %arg14[%c0_113, %c0_114] : memref<8x8xf32, #tpu.memory_space<vmem>>, vector<8x8xf32>
    tpu.vector_store %arg14[%c0_113, %c0_114], %319 {strides = array<i32>} : memref<8x8xf32, #tpu.memory_space<vmem>>, vector<8x8xf32>,
    return
  }
  func.func @transform_0(%arg0: i32) -> (i32, i32) {
    %c0_i32 = arith.constant 0 : i32
    %c0_i32_0 = arith.constant 0 : i32
    return %arg0, %c0_i32 : i32, i32
  }
  func.func @transform_1(%arg0: i32) -> (i32, i32) {
    %c0_i32 = arith.constant 0 : i32
    %c0_i32_0 = arith.constant 0 : i32
    %c0_i32_1 = arith.constant 0 : i32
    return %c0_i32, %c0_i32_0 : i32, i32
  }
  func.func @transform_2(%arg0: i32) -> (i32, i32) {
    %c0_i32 = arith.constant 0 : i32
    %c0_i32_0 = arith.constant 0 : i32
    %c0_i32_1 = arith.constant 0 : i32
    return %c0_i32, %c0_i32_0 : i32, i32
  }
  func.func @transform_3(%arg0: i32) -> (i32, i32) {
    %c0_i32 = arith.constant 0 : i32
    %c0_i32_0 = arith.constant 0 : i32
    %c0_i32_1 = arith.constant 0 : i32
    return %c0_i32, %c0_i32_0 : i32, i32
  }
  func.func @transform_4(%arg0: i32) -> (i32, i32) {
    %c0_i32 = arith.constant 0 : i32
    %c0_i32_0 = arith.constant 0 : i32
    %c0_i32_1 = arith.constant 0 : i32
    return %c0_i32, %c0_i32_0 : i32, i32
  }
  func.func @transform_5(%arg0: i32) -> (i32, i32) {
    %c0_i32 = arith.constant 0 : i32
    %c0_i32_0 = arith.constant 0 : i32
    %c0_i32_1 = arith.constant 0 : i32
    return %c0_i32, %c0_i32_0 : i32, i32
  }
  func.func @transform_6(%arg0: i32) -> (i32, i32) {
    %c0_i32 = arith.constant 0 : i32
    %c0_i32_0 = arith.constant 0 : i32
    %c0_i32_1 = arith.constant 0 : i32
    return %c0_i32, %c0_i32_0 : i32, i32
  }
  func.func @transform_7(%arg0: i32) -> (i32, i32) {
    %c0_i32 = arith.constant 0 : i32
    %c0_i32_0 = arith.constant 0 : i32
    %c0_i32_1 = arith.constant 0 : i32
    return %c0_i32, %c0_i32_0 : i32, i32
  }
  func.func @transform_8(%arg0: i32) -> (i32, i32) {
    %c0_i32 = arith.constant 0 : i32
    %c0_i32_0 = arith.constant 0 : i32
    %c0_i32_1 = arith.constant 0 : i32
    return %c0_i32, %c0_i32_0 : i32, i32
  }
  func.func @transform_9(%arg0: i32) -> (i32, i32) {
    %c0_i32 = arith.constant 0 : i32
    %c0_i32_0 = arith.constant 0 : i32
    %c0_i32_1 = arith.constant 0 : i32
    return %c0_i32, %c0_i32_0 : i32, i32
  }
  func.func @transform_10(%arg0: i32) -> (i32, i32) {
    %c0_i32 = arith.constant 0 : i32
    %c0_i32_0 = arith.constant 0 : i32
    %c0_i32_1 = arith.constant 0 : i32
    return %c0_i32, %c0_i32_0 : i32, i32
  }
  func.func @transform_11(%arg0: i32) -> (i32, i32) {
    %c0_i32 = arith.constant 0 : i32
    %c0_i32_0 = arith.constant 0 : i32
    %c0_i32_1 = arith.constant 0 : i32
    return %c0_i32, %c0_i32_0 : i32, i32
  }
  func.func @transform_12(%arg0: i32) -> (i32, i32) {
    %c0_i32 = arith.constant 0 : i32
    %c0_i32_0 = arith.constant 0 : i32
    return %arg0, %c0_i32 : i32, i32
  }
  func.func @transform_13(%arg0: i32) -> (i32, i32) {
    %c0_i32 = arith.constant 0 : i32
    %c0_i32_0 = arith.constant 0 : i32
    return %c0_i32, %arg0 : i32, i32
  }
}

</mosaic_0001>

<bundles_post_ra>
// kernel: tpu_custom_call.1
= control target key start
LH: loop header
LB: loop body
LE: loop exit
PB: predicated region body
PF: predicated region fallthrough
CT: control target
= control target key end

     0   :  { %s2426_s0 = inlined_call_operand.hbm [shape: f32[8,16], index: 0, kind: input, shape index: {}]   ;;  %s2427_s1 = inlined_call_operand.hbm [shape: f32[16,32], index: 1, kind: input, shape index: {}]   ;;  %s2428_s2 = inlined_call_operand.vmem [shape: f32[1,32], index: 2, kind: input, shape index: {}]   ;;  %s2429_s3 = inlined_call_operand.hbm [shape: f32[32,32], index: 3, kind: input, shape index: {}]   ;;  %s2430_s4 = inlined_call_operand.vmem [shape: f32[1,32], index: 4, kind: input, shape index: {}]   ;;  %s2431_s5 = inlined_call_operand.hbm [shape: f32[32,97], index: 5, kind: input, shape index: {}]   ;;  %s2432_s6 = inlined_call_operand.<no memory space> [shape: f32[1,1], index: 6, kind: input, shape index: {}]   ;;  %s2433_s7 = inlined_call_operand.hbm [shape: f32[8,96], index: 7, kind: input, shape index: {}]   ;;  %s2434_s8 = inlined_call_operand.vmem [shape: f32[32,96], index: 8, kind: input, shape index: {}]   ;;  %s2435_s9 = inlined_call_operand.vmem [shape: f32[1,32], index: 9, kind: input, shape index: {}]   ;;  %s2436_s10 = inlined_call_operand.vmem [shape: f32[1,32], index: 10, kind: input, shape index: {}]   ;;  %s2437_s12 = inlined_call_operand.vmem [shape: f32[8,1], index: 12, kind: output, shape index: {0}]   ;;  %s2438_s13 = inlined_call_operand.hbm [shape: f32[8,8], index: 13, kind: output, shape index: {1}]   ;;  %s2439_s11 = inlined_call_operand.<no memory space> [shape: f32[1,1], index: 11, kind: input, shape index: {}]  }
   0x1   :  { %v19_v0 = vstv %s2432_s6  ;;  %v21_v1 = vstv %s2439_s11 }
   0x2   :  { %20 = vst [vmem:[#allocation4] sm:$0x1] %v19_v0  ;;  %22 = vst [vmem:[#allocation5] sm:$0x1] %v21_v1 }
   0x3   :  { %23 = vsyncpa [#allocation7], 0 }
   0x4   :  { %24 = vsyncpa [#allocation10], 0 }
   0x5   :  { %25 = vsyncpa [#allocation13], 0 }
   0x6   :  { %26 = vsyncpa [#allocation8], 0  ;;  %s2067_s29 = smov [#allocation9]   ;;  %s1927_s16 = scalar_lea.hbm %s2427_s1, 256 }
   0x7   :  { %s42_s30 = sshll.u32 %s2067_s29, 4  ;;  %p1928_p0 = scmp.ne.s32.totalorder %s2427_s1, %s1927_s16  ;;  %s43_s30 = int_to_ptr.vmem [resolvable:$true] %s42_s30 }
   0x8   :  { %p1931_p1 = scmp.lt.u32.totalorder %s1927_s16, %s2427_s1 }
   0xa   :  { %p1933_p2 = pnand %p1931_p1, %p1928_p0 }
   0xc   :  { %1936 = shalt.err (!%p1933_p2)
}
   0xd   :  { %s1937_s11 = scalar_lea.vmem %s43_s30, 256  ;;  %p1942_p4 = scmp.lt.s32.totalorder %s43_s30, %s43_s30 }
   0xe   :  { %p1938_p3 = scmp.ne.s32.totalorder %s43_s30, %s1937_s11  ;;  %p1943_p5 = scmp.lt.s32.totalorder %s1937_s11, %s1937_s11 }
  0x10   :  { %p1944_p6 = por %p1943_p5, %p1942_p4 }
  0x12   :  { %p1945_p7 = pnand %p1944_p6, %p1938_p3 }
  0x14   :  { %1948 = shalt.err (!%p1945_p7)
}
  0x15   :  { %s2068_s20 = smov 128   ;;  %s2069_s21 = smov 8  }
  0x16   :  { %48 = dma.hbm_to_vmem [thread:$0]  %s2427_s1, 256, %s43_s30, [#allocation10], %s2068_s20, %s2068_s20, %s2069_s21  }
  0x17   :  { %s2070_s24 = smov [#allocation12]   ;;  %s2071_s26 = smov [#allocation6]  }
  0x18   :  { %s70_s25 = sshll.u32 %s2070_s24, 4  ;;  %s33_s27 = sshll.u32 %s2071_s26, 4  ;;  %s71_s25 = int_to_ptr.vmem [resolvable:$true] %s70_s25  ;;  %s34_s27 = int_to_ptr.vmem [resolvable:$true] %s33_s27 }
  0x19   :  { %s1949_s14 = scalar_lea.hbm %s2431_s5, 512 }
  0x1a   :  { %p1950_p8 = scmp.ne.s32.totalorder %s2431_s5, %s1949_s14  ;;  %p1953_p9 = scmp.lt.u32.totalorder %s1949_s14, %s2431_s5 }
  0x1c   :  { %p1955_p10 = pnand %p1953_p9, %p1950_p8 }
  0x1e   :  { %1958 = shalt.err (!%p1955_p10)
}
  0x1f   :  { %s1959_s1 = scalar_lea.vmem %s71_s25, 512  ;;  %p1964_p12 = scmp.lt.s32.totalorder %s71_s25, %s71_s25 }
  0x20   :  { %p1960_p11 = scmp.ne.s32.totalorder %s71_s25, %s1959_s1  ;;  %p1965_p13 = scmp.lt.s32.totalorder %s1959_s1, %s1959_s1 }
  0x22   :  { %p1966_p0 = por %p1965_p13, %p1964_p12 }
  0x24   :  { %p1967_p1 = pnand %p1966_p0, %p1960_p11 }
  0x26   :  { %1970 = shalt.err (!%p1967_p1)
}
  0x27   :  { %76 = dma.hbm_to_vmem [thread:$0]  %s2431_s5, 512, %s71_s25, [#allocation13], %s2068_s20, %s2068_s20, %s2069_s21  }
  0x28   :  { %s1971_s22 = scalar_lea.hbm %s2426_s0, 128 }
  0x29   :  { %p1972_p2 = scmp.ne.s32.totalorder %s2426_s0, %s1971_s22  ;;  %p1975_p3 = scmp.lt.u32.totalorder %s1971_s22, %s2426_s0 }
  0x2b   :  { %p1977_p4 = pnand %p1975_p3, %p1972_p2 }
  0x2d   :  { %1980 = shalt.err (!%p1977_p4)
}
  0x2e   :  { %s1981_s29 = scalar_lea.vmem %s34_s27, 128  ;;  %p1986_p6 = scmp.lt.s32.totalorder %s34_s27, %s34_s27 }
  0x2f   :  { %p1982_p5 = scmp.ne.s32.totalorder %s34_s27, %s1981_s29  ;;  %p1987_p7 = scmp.lt.s32.totalorder %s1981_s29, %s1981_s29 }
  0x31   :  { %p1988_p8 = por %p1987_p7, %p1986_p6 }
  0x33   :  { %p1989_p9 = pnand %p1988_p8, %p1982_p5 }
  0x35   :  { %1992 = shalt.err (!%p1989_p9)
}
  0x36   :  { %36 = dma.hbm_to_vmem [thread:$0]  %s2426_s0, 128, %s34_s27, [#allocation7]  }
  0x37   :  { %s2072_s14 = smov [#allocation11]   ;;  %s2073_s16 = smov [#allocation14]  }
  0x38   :  { %s56_s15 = sshll.u32 %s2072_s14, 4  ;;  %s85_s17 = sshll.u32 %s2073_s16, 4  ;;  %s57_s15 = int_to_ptr.vmem [resolvable:$true] %s56_s15  ;;  %s86_s17 = int_to_ptr.vmem [resolvable:$true] %s85_s17 }
  0x39   :  { %s1993_s30 = scalar_lea.hbm %s2429_s3, 512 }
  0x3a   :  { %p1994_p10 = scmp.ne.s32.totalorder %s2429_s3, %s1993_s30  ;;  %p1997_p11 = scmp.lt.u32.totalorder %s1993_s30, %s2429_s3 }
  0x3c   :  { %p1999_p12 = pnand %p1997_p11, %p1994_p10 }
  0x3e   :  { %2002 = shalt.err (!%p1999_p12)
}
  0x3f   :  { %s2003_s0 = scalar_lea.vmem %s57_s15, 512  ;;  %p2008_p0 = scmp.lt.s32.totalorder %s57_s15, %s57_s15 }
  0x40   :  { %p2004_p13 = scmp.ne.s32.totalorder %s57_s15, %s2003_s0  ;;  %p2009_p1 = scmp.lt.s32.totalorder %s2003_s0, %s2003_s0 }
  0x42   :  { %p2010_p2 = por %p2009_p1, %p2008_p0 }
  0x44   :  { %p2011_p3 = pnand %p2010_p2, %p2004_p13 }
  0x46   :  { %2014 = shalt.err (!%p2011_p3)
}
  0x47   :  { %62 = dma.hbm_to_vmem [thread:$0]  %s2429_s3, 512, %s57_s15, [#allocation10], %s2068_s20, %s2068_s20, %s2069_s21  }
  0x48   :  { %s2015_s28 = scalar_lea.hbm %s2433_s7, 128 }
  0x49   :  { %p2016_p4 = scmp.ne.s32.totalorder %s2433_s7, %s2015_s28  ;;  %p2019_p5 = scmp.lt.u32.totalorder %s2015_s28, %s2433_s7 }
  0x4b   :  { %p2021_p6 = pnand %p2019_p5, %p2016_p4 }
  0x4d   :  { %2024 = shalt.err (!%p2021_p6)
}
  0x4e   :  { %s2025_s16 = scalar_lea.vmem %s86_s17, 128  ;;  %p2030_p8 = scmp.lt.s32.totalorder %s86_s17, %s86_s17 }
  0x4f   :  { %p2026_p7 = scmp.ne.s32.totalorder %s86_s17, %s2025_s16  ;;  %p2031_p9 = scmp.lt.s32.totalorder %s2025_s16, %s2025_s16 }
  0x51   :  { %p2032_p10 = por %p2031_p9, %p2030_p8 }
  0x53   :  { %p2033_p11 = pnand %p2032_p10, %p2026_p7 }
  0x55   :  { %2036 = shalt.err (!%p2033_p11)
}
  0x56   :  { %88 = dma.hbm_to_vmem [thread:$0]  %s2433_s7, 128, %s86_s17, [#allocation13]  }
  0x57   :  { %2059 = dma.done.wait [#allocation7], 128  }
  0x58   :  { %2060 = vsyncadd [#allocation7], 4294967168 }
  0x59   :  { %2061 = dma.done.wait [#allocation10], 768  }
  0x5a   :  { %2062 = vsyncadd [#allocation10], 4294966528 }
  0x5b   :  { %2063 = dma.done.wait [#allocation13], 640  }
  0x5c   :  { %2064 = vsyncadd [#allocation13], 4294966656  ;;  %v2074_v2 = vmov 0.0|0.0   ;;  %vm2075_vm0 = vmmov 0   ;;  %v2076_v3 = vmov 0.0   ;;  %v113_v4 = vld [vmem:[#allocation9] sm:$0xff]  ;;  %v396_v43 = vlaneseq }
  0x5d   :  { %1761 = vmatprep.subr.bf16.mxu0 %v2074_v2  ;;  %1648 = vmatprep.mubr.msk.f32.mxu0 %vm2075_vm0, %v2076_v3  ;;  %v114_v5 = vld [vmem:[#allocation9 + $0x8] sm:$0xff]  ;;  %v197_v7 = vld [vmem:[#allocation11] sm:$0xff]  ;;  %v198_v8 = vld [vmem:[#allocation11 + $0x8] sm:$0xff]  ;;  %vm122_vm1 = vcmask 130048   ;;  %vm208_vm2 = vcmask 261120   ;;  %s2077_s22 = smov 64  }
  0x5e   :  { %1764 = vmatprep.subr.bf16.mxu1 %v2074_v2  ;;  %1659 = vmatprep.mubr.msk.f32.mxu1 %vm2075_vm0, %v2076_v3  ;;  %v1762_v6 = vpack.c.bf16 %v114_v5, %v113_v4  ;;  %v1765_v9 = vpack.c.bf16 %v198_v8, %v197_v7  ;;  %v112_v10 = vld [vmem:[#allocation6] sm:$0xff]  ;;  %v199_v11 = vld [vmem:[#allocation11 + $0x10] sm:$0xff]  ;;  %v200_v12 = vld [vmem:[#allocation11 + $0x18] sm:$0xff]  ;;  %v2078_v41 = vmov 1966171168   ;;  %v2293_v45 = vshrl.u32 %v396_v43, 7 }
  0x5f   :  { %v1768_v13 = vpack.c.bf16 %v200_v12, %v199_v11  ;;  %v283_v14 = vld [vmem:[#allocation12] sm:$0xff]  ;;  %v284_v15 = vld [vmem:[#allocation12 + $0x8] sm:$0xff]  ;;  %v506_v25 = vld [vmem:[%s2434_s8 + $0x10] sm:$0xff]  ;;  %v394_v42 = vunpack.c.l.s4 %v2078_v41  ;;  %vm489_vm3 = vcmask 785408   ;;  %vm388_vm6 = vcmask 7168  }
  0x60   :  { %1763 = vmatpush3.bf16.msra.mxu0 %v1762_v6  ;;  %1766 = vmatpush3.bf16.msra.mxu1 %v1765_v9  ;;  %v1771_v16 = vpack.c.bf16 %v284_v15, %v283_v14  ;;  %v1559_v17 = vld [vmem:[%s2428_s2] ss:$0 sm:$0xff]  ;;  %v505_v19 = vld [vmem:[%s2434_s8 + $0x8] sm:$0xff]  ;;  %v507_v26 = vld [vmem:[%s2434_s8 + $0x18] sm:$0xff]  ;;  %v443_v59 = vsub.s32 0, %v2293_v45  ;;  %vm1521_vm7 = vcmask 1041409  }
  0x61   :  { %1770 = vmatprep.subr.bf16.mxu0 %v2074_v2  ;;  %1767 = vmatprep.subr.bf16.mxu1 %v2074_v2  ;;  %v504_v18 = vld [vmem:[%s2434_s8] sm:$0xff]  ;;  %v2259_v27 = vpack.c.bf16 %v507_v26, %v506_v25  ;;  %v285_v28 = vld [vmem:[#allocation12 + $0x10] sm:$0xff]  ;;  %v286_v29 = vld [vmem:[#allocation12 + $0x18] sm:$0xff]  ;;  %v395_v44 = vunpack.c.0.s8 %v394_v42  ;;  %vm1523_vm8 = vcmask 1042434   ;;  %vm1525_vm9 = vcmask 1043459  }
  0x62   :  { %v2249_v23 = vpack.c.bf16 %v505_v19, %v504_v18  ;;  %v1774_v30 = vpack.c.bf16 %v286_v29, %v285_v28  ;;  %v1565_v31 = vld [vmem:[%s2435_s9] ss:$0 sm:$0xff]  ;;  %vm1527_vm10 = vcmask 1044484   ;;  %vm1529_vm11 = vcmask 1045509  }
  0x63   :  { %1649 = vmatmul.mubr.msk.f32.vlgmr.msra.gmra.mrb[0].mxu0 %vm122_vm1, %v112_v10  ;;  %589 = vrot.lane.b32.xlu0 %v1565_v31, %s2077_s22  ;;  %v1561_v32 = vld [vmem:[%s2430_s4] ss:$0 sm:$0xff]  ;;  %v398_v47 = vsub.s32 %v395_v44, %v2293_v45  ;;  %s2079_s4 = smov 96   ;;  %vm1531_vm12 = vcmask 1046534   ;;  %vm1533_vm13 = vcmask 1047559   ;;  %vm1536_vm14 = vcmask 64512  }
  0x64   :  { %1670 = vmatprep.mubr.msk.f32.mxu0 %vm2075_vm0, %v2076_v3  ;;  %1769 = vmatpush3.bf16.msra.mxu1 %v1768_v13  ;;  %v390_v46 = vld [vmem:[#allocation14] sm:$0xff] }
  0x65   :  { %1776 = vmatprep.subr.bf16.mxu1 %v2074_v2  ;;  %1772 = vmatpush3.bf16.msra.mxu0 %v1771_v16  ;;  %v392_v48 = vcombine.high %v390_v46, %v390_v46  ;;  %v399_v49 = vrot.slane %v390_v46, %v398_v47 }
  0x66   :  { %1773 = vmatprep.subr.bf16.mxu0 %v2074_v2 }
  0x67   :  { %v406_v50 = vrot.slane %v392_v48, %v398_v47  ;;  %v407_v51 = vcombine.high %v399_v49, %v399_v49  ;;  %v415_v53 = vrot.slane %v399_v49, %v398_v47 }
  0x69   :  { %1775 = vmatpush3.bf16.msra.mxu0 %v1774_v30  ;;  %v408_v52 = vcombine.high %v406_v50, %v406_v50  ;;  %v429_v54 = vrot.slane %v407_v51, %v398_v47  ;;  %v422_v55 = vrot.slane %v406_v50, %v398_v47  ;;  %v437_v57 = vcombine.high %v415_v53, %v415_v53 }
  0x6a   :  { %1782 = vmatprep.subr.bf16.mxu0 %v2074_v2  ;;  %v444_v62 = vrot.slane %v415_v53, %v443_v59 }
  0x6b   :  { %v436_v56 = vrot.slane %v408_v52, %v398_v47  ;;  %v439_v58 = vcombine.high %v429_v54, %v429_v54  ;;  %v438_v60 = vcombine.high %v422_v55, %v422_v55  ;;  %v448_v63 = vrot.slane %v429_v54, %v443_v59 }
  0x6c   :  { %v452_v0 = vrot.slane %v437_v57, %v443_v59  ;;  %v460_v4 = vrot.slane %v422_v55, %v443_v59 }
  0x6d   :  { %v440_v61 = vcombine.high %v436_v56, %v436_v56  ;;  %v456_v1 = vrot.slane %v439_v58, %v443_v59  ;;  %v464_v5 = vrot.slane %v436_v56, %v443_v59  ;;  %v468_v6 = vrot.slane %v438_v60, %v443_v59 }
  0x6f   :  { %v472_v7 = vrot.slane %v440_v61, %v443_v59 }
  0xd5   :  { %v2282_v37 = vpop.permute.xlu0 %589 }
 0x136   :  { %v192_v20 = vpop.f32.mrb[0].mxu0 }
 0x137   :  { %v193_v21 = vadd.f32 %v1559_v17, %v192_v20  ;;  %v1650_v22 = vpop.f32.mrb[1].mxu0 }
 0x139   :  { %v196_v24 = vmax.f32 %v193_v21, 0.0 }
 0x13b   :  { %1660 = vmatmul.mubr.msk.f32.vlgmr.msra.gmra.mrb[0].mxu1 %vm208_vm2, %v196_v24 }
 0x13c   :  { %1778 = vmatpush3.bf16.msra.mxu1 %v2249_v23  ;;  %1681 = vmatprep.mubr.msk.f32.mxu1 %vm2075_vm0, %v2076_v3 }
 0x13d   :  { %1779 = vmatprep.subr.bf16.mxu1 %v2074_v2 }
 0x140   :  { %1781 = vmatpush3.bf16.msra.mxu1 %v2259_v27 }
 0x141   :  { %1788 = vmatprep.subr.bf16.mxu1 %v2074_v2 }
 0x143   :  { %1682 = vmatmul.mubr.f32.vlgmr.msra.gmra.mrb[2].mxu1 %v2076_v3 }
 0x144   :  { %1790 = vmatpush3.bf16.msra.mxu1 %v2249_v23  ;;  %1703 = vmatprep.mubr.msk.f32.mxu1 %vm2075_vm0, %v2076_v3 }
 0x145   :  { %1791 = vmatprep.subr.bf16.mxu1 %v2074_v2 }
 0x148   :  { %1793 = vmatpush3.bf16.msra.mxu1 %v2259_v27 }
 0x149   :  { %1800 = vmatprep.subr.bf16.mxu1 %v2074_v2 }
 0x20e   :  { %v278_v33 = vpop.f32.mrb[0].mxu1 }
 0x20f   :  { %v279_v34 = vadd.f32 %v1561_v32, %v278_v33  ;;  %v1661_v35 = vpop.f32.mrb[1].mxu1 }
 0x211   :  { %v282_v36 = vmax.f32 %v279_v34, 0.0 }
 0x213   :  { %1671 = vmatmul.mubr.msk.f32.vlgmr.msra.gmra.mrb[2].mxu0 %vm208_vm2, %v282_v36 }
 0x214   :  { %1784 = vmatpush3.bf16.msra.mxu0 %v2249_v23  ;;  %1692 = vmatprep.mubr.msk.f32.mxu0 %vm2075_vm0, %v2076_v3 }
 0x215   :  { %1785 = vmatprep.subr.bf16.mxu0 %v2074_v2 }
 0x216   :  { %v578_v38 = vpop.f32.mrb[2].mxu1 }
 0x217   :  { %v1683_v39 = vpop.f32.mrb[3].mxu1  ;;  %v592_v40 = vadd.f32 %v2282_v37, %v578_v38 }
 0x218   :  { %1787 = vmatpush3.bf16.msra.mxu0 %v2259_v27 }
 0x219   :  { %594 = vrot.lane.b32.xlu0 %v592_v40, %s2077_s22  ;;  %1794 = vmatprep.subr.bf16.mxu0 %v2074_v2 }
 0x28b   :  { %v595_v24 = vpop.permute.xlu0 %594 }
 0x2e6   :  { %v2297_v8 = vpop.f32.mrb[2].mxu0 }
 0x2e7   :  { %v481_v9 = vadd.f32 %v444_v62, %v2297_v8  ;;  %v482_v10 = vadd.f32 %v448_v63, %v2297_v8  ;;  %v483_v11 = vadd.f32 %v452_v0, %v2297_v8  ;;  %v484_v12 = vadd.f32 %v456_v1, %v2297_v8  ;;  %v1672_v13 = vpop.f32.mrb[3].mxu0 }
 0x2e8   :  { %v485_v14 = vadd.f32 %v460_v4, %v2297_v8  ;;  %v486_v15 = vadd.f32 %v464_v5, %v2297_v8  ;;  %v487_v16 = vadd.f32 %v468_v6, %v2297_v8  ;;  %v488_v17 = vadd.f32 %v472_v7, %v2297_v8 }
 0x2e9   :  { %490 = vst.msk [vmem:[#allocation2] sm:$0xff] %vm489_vm3, %v481_v9  ;;  %491 = vst.msk [vmem:[#allocation2 + $0x8] sm:$0xff] %vm489_vm3, %v482_v10 }
 0x2ea   :  { %492 = vst.msk [vmem:[#allocation2 + $0x10] sm:$0xff] %vm489_vm3, %v483_v11  ;;  %493 = vst.msk [vmem:[#allocation2 + $0x18] sm:$0xff] %vm489_vm3, %v484_v12 }
 0x2eb   :  { %494 = vst.msk [vmem:[#allocation2 + $0x20] sm:$0xff] %vm489_vm3, %v485_v14  ;;  %495 = vst.msk [vmem:[#allocation2 + $0x28] sm:$0xff] %vm489_vm3, %v486_v15 }
 0x2ec   :  { %496 = vst.msk [vmem:[#allocation2 + $0x30] sm:$0xff] %vm489_vm3, %v487_v16  ;;  %497 = vst.msk [vmem:[#allocation2 + $0x38] sm:$0xff] %vm489_vm3, %v488_v17 }
 0x2f0   :  { %v508_v18 = vld [vmem:[#allocation2] sm:$0xff]  ;;  %v618_v41 = vld [vmem:[#allocation2 + $0x8] sm:$0xff] }
 0x2f1   :  { %v582_v19 = vadd.f32 %v578_v38, %v508_v18  ;;  %v725_v63 = vld [vmem:[#allocation2 + $0x10] sm:$0xff] }
 0x2f3   :  { %v1566_v20 = vmul.f32 -1.442695, %v582_v19 }
 0x2f5   :  { %1843 = vpow2.f32 %v1566_v20 }
 0x2ff   :  { %v1844_v21 = vpop.eup %1843 }
 0x300   :  { %v586_v22 = vadd.f32 1.0, %v1844_v21 }
 0x302   :  { %1845 = vrcp.f32 %v586_v22  ;;  %v832_v22 = vld [vmem:[#allocation2 + $0x18] sm:$0xff] }
 0x30c   :  { %v1846_v25 = vpop.eup %1845 }
 0x30d   :  { %v597_v26 = vmul.f32 %v1846_v25, %v595_v24  ;;  %v604_v31 = vsub.f32 1.0, %v1846_v25  ;;  %v610_v33 = vmul.f32 0.0, %v1846_v25 }
 0x30f   :  { %599 = vrot.lane.b32.xlu1 %v597_v26, %s2077_s22 }
 0x381   :  { %v600_v28 = vpop.permute.xlu1 %599 }
 0x382   :  { %v602_v29 = vadd.f32 %v600_v28, %v508_v18 }
 0x384   :  { %1847 = vtanh.f32 %v602_v29 }
 0x38e   :  { %v1848_v30 = vpop.eup %1847 }
 0x38f   :  { %606 = vrot.lane.b32.xlu1 %v1848_v30, %s2079_s4 }
 0x401   :  { %v607_v32 = vpop.permute.xlu1 %606 }
 0x402   :  { %v609_v34 = vmul.f32 %v607_v32, %v604_v31 }
 0x404   :  { %v611_v35 = vadd.f32 %v610_v33, %v609_v34 }
 0x406   :  { %613 = vrot.lane.b32.xlu0 %v611_v35, %s2079_s4 }
 0x478   :  { %v614_v36 = vpop.permute.xlu0 %613 }
 0x479   :  { %616 = vst.msk [vmem:[#allocation3] sm:$0xff] %vm208_vm2, %v614_v36  ;;  %1693 = vmatmul.mubr.msk.f32.vlgmr.msra.gmra.mrb[4].mxu0 %vm208_vm2, %v614_v36 }
 0x47a   :  { %1796 = vmatpush3.bf16.msra.mxu0 %v2249_v23  ;;  %1714 = vmatprep.mubr.msk.f32.mxu0 %vm2075_vm0, %v2076_v3 }
 0x47b   :  { %1797 = vmatprep.subr.bf16.mxu0 %v2074_v2 }
 0x47e   :  { %1799 = vmatpush3.bf16.msra.mxu0 %v2259_v27 }
 0x47f   :  { %1806 = vmatprep.subr.bf16.mxu0 %v2074_v2 }
 0x54c   :  { %v687_v38 = vpop.f32.mrb[4].mxu0 }
 0x54d   :  { %v698_v39 = vadd.f32 %v687_v38, %v2282_v37  ;;  %v1694_v40 = vpop.f32.mrb[5].mxu0  ;;  %v691_v42 = vadd.f32 %v687_v38, %v618_v41 }
 0x54f   :  { %700 = vrot.lane.b32.xlu1 %v698_v39, %s2077_s22  ;;  %v1568_v44 = vmul.f32 -1.442695, %v691_v42 }
 0x551   :  { %1849 = vpow2.f32 %v1568_v44 }
 0x55b   :  { %v1850_v46 = vpop.eup %1849 }
 0x55c   :  { %v695_v47 = vadd.f32 1.0, %v1850_v46 }
 0x55e   :  { %1851 = vrcp.f32 %v695_v47  ;;  %v939_v47 = vld [vmem:[#allocation2 + $0x20] sm:$0xff] }
 0x568   :  { %v1852_v48 = vpop.eup %1851 }
 0x569   :  { %v710_v54 = vsub.f32 1.0, %v1852_v48  ;;  %v716_v56 = vmul.f32 %v1852_v48, %v611_v35 }
 0x5c1   :  { %v701_v49 = vpop.permute.xlu1 %700 }
 0x5c2   :  { %v703_v50 = vmul.f32 %v1852_v48, %v701_v49 }
 0x5c4   :  { %705 = vrot.lane.b32.xlu0 %v703_v50, %s2077_s22 }
 0x636   :  { %v706_v51 = vpop.permute.xlu0 %705 }
 0x637   :  { %v708_v52 = vadd.f32 %v706_v51, %v618_v41 }
 0x639   :  { %1853 = vtanh.f32 %v708_v52 }
 0x643   :  { %v1854_v53 = vpop.eup %1853 }
 0x644   :  { %712 = vrot.lane.b32.xlu1 %v1854_v53, %s2079_s4 }
 0x6b6   :  { %v713_v55 = vpop.permute.xlu1 %712 }
 0x6b7   :  { %v715_v57 = vmul.f32 %v713_v55, %v710_v54 }
 0x6b9   :  { %v717_v58 = vadd.f32 %v716_v56, %v715_v57 }
 0x6bb   :  { %719 = vrot.lane.b32.xlu0 %v717_v58, %s2079_s4 }
 0x72d   :  { %v720_v59 = vpop.permute.xlu0 %719 }
 0x72e   :  { %723 = vst.msk [vmem:[#allocation3 + $0x8] sm:$0xff] %vm208_vm2, %v720_v59  ;;  %1704 = vmatmul.mubr.msk.f32.vlgmr.msra.gmra.mrb[4].mxu1 %vm208_vm2, %v720_v59 }
 0x72f   :  { %1802 = vmatpush3.bf16.msra.mxu1 %v2249_v23  ;;  %1725 = vmatprep.mubr.msk.f32.mxu1 %vm2075_vm0, %v2076_v3 }
 0x730   :  { %1803 = vmatprep.subr.bf16.mxu1 %v2074_v2 }
 0x733   :  { %1805 = vmatpush3.bf16.msra.mxu1 %v2259_v27 }
 0x734   :  { %1812 = vmatprep.subr.bf16.mxu1 %v2074_v2 }
 0x801   :  { %v794_v60 = vpop.f32.mrb[4].mxu1 }
 0x802   :  { %v805_v61 = vadd.f32 %v794_v60, %v2282_v37  ;;  %v1705_v62 = vpop.f32.mrb[5].mxu1  ;;  %v798_v0 = vadd.f32 %v794_v60, %v725_v63 }
 0x804   :  { %807 = vrot.lane.b32.xlu1 %v805_v61, %s2077_s22  ;;  %v1570_v1 = vmul.f32 -1.442695, %v798_v0 }
 0x806   :  { %1855 = vpow2.f32 %v1570_v1 }
 0x810   :  { %v1856_v4 = vpop.eup %1855 }
 0x811   :  { %v802_v5 = vadd.f32 1.0, %v1856_v4 }
 0x813   :  { %1857 = vrcp.f32 %v802_v5  ;;  %v1046_v5 = vld [vmem:[#allocation2 + $0x28] sm:$0xff] }
 0x81d   :  { %v1858_v6 = vpop.eup %1857 }
 0x81e   :  { %v817_v13 = vsub.f32 1.0, %v1858_v6  ;;  %v823_v15 = vmul.f32 %v1858_v6, %v717_v58 }
 0x876   :  { %v808_v7 = vpop.permute.xlu1 %807 }
 0x877   :  { %v810_v9 = vmul.f32 %v1858_v6, %v808_v7 }
 0x879   :  { %812 = vrot.lane.b32.xlu0 %v810_v9, %s2077_s22 }
 0x8eb   :  { %v813_v10 = vpop.permute.xlu0 %812 }
 0x8ec   :  { %v815_v11 = vadd.f32 %v813_v10, %v725_v63 }
 0x8ee   :  { %1859 = vtanh.f32 %v815_v11 }
 0x8f8   :  { %v1860_v12 = vpop.eup %1859 }
 0x8f9   :  { %819 = vrot.lane.b32.xlu1 %v1860_v12, %s2079_s4 }
 0x96b   :  { %v820_v14 = vpop.permute.xlu1 %819 }
 0x96c   :  { %v822_v16 = vmul.f32 %v820_v14, %v817_v13 }
 0x96e   :  { %v824_v17 = vadd.f32 %v823_v15, %v822_v16 }
 0x970   :  { %826 = vrot.lane.b32.xlu0 %v824_v17, %s2079_s4 }
 0x9e2   :  { %v827_v18 = vpop.permute.xlu0 %826 }
 0x9e3   :  { %830 = vst.msk [vmem:[#allocation3 + $0x10] sm:$0xff] %vm208_vm2, %v827_v18  ;;  %1715 = vmatmul.mubr.msk.f32.vlgmr.msra.gmra.mrb[6].mxu0 %vm208_vm2, %v827_v18 }
 0x9e4   :  { %1808 = vmatpush3.bf16.msra.mxu0 %v2249_v23  ;;  %1736 = vmatprep.mubr.msk.f32.mxu0 %vm2075_vm0, %v2076_v3 }
 0x9e5   :  { %1809 = vmatprep.subr.bf16.mxu0 %v2074_v2 }
 0x9e8   :  { %1811 = vmatpush3.bf16.msra.mxu0 %v2259_v27 }
 0x9e9   :  { %1818 = vmatprep.subr.bf16.mxu0 %v2074_v2 }
 0xab6   :  { %v901_v19 = vpop.f32.mrb[6].mxu0 }
 0xab7   :  { %v912_v20 = vadd.f32 %v901_v19, %v2282_v37  ;;  %v1716_v21 = vpop.f32.mrb[7].mxu0  ;;  %v905_v24 = vadd.f32 %v901_v19, %v832_v22 }
 0xab9   :  { %914 = vrot.lane.b32.xlu1 %v912_v20, %s2077_s22  ;;  %v1572_v25 = vmul.f32 -1.442695, %v905_v24 }
 0xabb   :  { %1861 = vpow2.f32 %v1572_v25 }
 0xac5   :  { %v1862_v26 = vpop.eup %1861 }
 0xac6   :  { %v909_v28 = vadd.f32 1.0, %v1862_v26 }
 0xac8   :  { %1863 = vrcp.f32 %v909_v28 }
 0xad2   :  { %v1864_v29 = vpop.eup %1863 }
 0xad3   :  { %v924_v35 = vsub.f32 1.0, %v1864_v29  ;;  %v930_v38 = vmul.f32 %v1864_v29, %v824_v17 }
 0xb2b   :  { %v915_v30 = vpop.permute.xlu1 %914 }
 0xb2c   :  { %v917_v31 = vmul.f32 %v1864_v29, %v915_v30 }
 0xb2e   :  { %919 = vrot.lane.b32.xlu0 %v917_v31, %s2077_s22 }
 0xba0   :  { %v920_v32 = vpop.permute.xlu0 %919 }
 0xba1   :  { %v922_v33 = vadd.f32 %v920_v32, %v832_v22  ;;  %v1153_v22 = vld [vmem:[#allocation2 + $0x30] sm:$0xff] }
 0xba3   :  { %1865 = vtanh.f32 %v922_v33 }
 0xbad   :  { %v1866_v34 = vpop.eup %1865 }
 0xbae   :  { %926 = vrot.lane.b32.xlu1 %v1866_v34, %s2079_s4 }
 0xc20   :  { %v927_v36 = vpop.permute.xlu1 %926 }
 0xc21   :  { %v929_v39 = vmul.f32 %v927_v36, %v924_v35 }
 0xc23   :  { %v931_v40 = vadd.f32 %v930_v38, %v929_v39 }
 0xc25   :  { %933 = vrot.lane.b32.xlu0 %v931_v40, %s2079_s4 }
 0xc97   :  { %v934_v41 = vpop.permute.xlu0 %933 }
 0xc98   :  { %937 = vst.msk [vmem:[#allocation3 + $0x18] sm:$0xff] %vm208_vm2, %v934_v41  ;;  %1726 = vmatmul.mubr.msk.f32.vlgmr.msra.gmra.mrb[6].mxu1 %vm208_vm2, %v934_v41 }
 0xc99   :  { %1814 = vmatpush3.bf16.msra.mxu1 %v2249_v23  ;;  %1747 = vmatprep.mubr.msk.f32.mxu1 %vm2075_vm0, %v2076_v3 }
 0xc9a   :  { %1815 = vmatprep.subr.bf16.mxu1 %v2074_v2 }
 0xc9d   :  { %1817 = vmatpush3.bf16.msra.mxu1 %v2259_v27 }
 0xd6b   :  { %v1008_v42 = vpop.f32.mrb[6].mxu1 }
 0xd6c   :  { %v1019_v44 = vadd.f32 %v1008_v42, %v2282_v37  ;;  %v1727_v46 = vpop.f32.mrb[7].mxu1  ;;  %v1012_v48 = vadd.f32 %v1008_v42, %v939_v47 }
 0xd6e   :  { %1021 = vrot.lane.b32.xlu1 %v1019_v44, %s2077_s22  ;;  %v1574_v49 = vmul.f32 -1.442695, %v1012_v48 }
 0xd70   :  { %1867 = vpow2.f32 %v1574_v49 }
 0xd7a   :  { %v1868_v50 = vpop.eup %1867 }
 0xd7b   :  { %v1016_v51 = vadd.f32 1.0, %v1868_v50 }
 0xd7d   :  { %1869 = vrcp.f32 %v1016_v51 }
 0xd87   :  { %v1870_v52 = vpop.eup %1869 }
 0xd88   :  { %v1031_v58 = vsub.f32 1.0, %v1870_v52  ;;  %v1037_v60 = vmul.f32 %v1870_v52, %v931_v40 }
 0xde0   :  { %v1022_v53 = vpop.permute.xlu1 %1021 }
 0xde1   :  { %v1024_v54 = vmul.f32 %v1870_v52, %v1022_v53 }
 0xde3   :  { %1026 = vrot.lane.b32.xlu0 %v1024_v54, %s2077_s22 }
 0xe55   :  { %v1027_v55 = vpop.permute.xlu0 %1026 }
 0xe56   :  { %v1029_v56 = vadd.f32 %v1027_v55, %v939_v47  ;;  %v1260_v47 = vld [vmem:[#allocation2 + $0x38] sm:$0xff]  ;;  %v2080_v55 = vmov 0  }
 0xe57   :  { %1840 = vset.pattern.permute.xlu1 %v2080_v55  ;;  %1841 = vset.pattern.permute.xlu0 %v2080_v55 }
 0xe58   :  { %1871 = vtanh.f32 %v1029_v56 }
 0xe62   :  { %v1872_v57 = vpop.eup %1871 }
 0xe63   :  { %1033 = vrot.lane.b32.xlu1 %v1872_v57, %s2079_s4 }
 0xed5   :  { %v1034_v59 = vpop.permute.xlu1 %1033 }
 0xed6   :  { %v1036_v61 = vmul.f32 %v1034_v59, %v1031_v58  ;;  %v1564_v58 = vld [vmem:[#allocation4] ss:$0 sm:$0xff]  ;;  %v1367_v59 = vld [vmem:[#allocation3 + $0x8] sm:$0xff] }
 0xed8   :  { %v1038_v62 = vadd.f32 %v1037_v60, %v1036_v61  ;;  %v1581_v60 = vld [vmem:[%s2436_s10] ss:$0 sm:$0xff]  ;;  %s2081_s10 = smov 32  }
 0xed9   :  { %v1382_v61 = vmul.f32 %v1581_v60, %v1367_v59 }
 0xeda   :  { %1040 = vrot.lane.b32.xlu0 %v1038_v62, %s2079_s4 }
 0xf4c   :  { %v1041_v63 = vpop.permute.xlu0 %1040 }
 0xf4d   :  { %1044 = vst.msk [vmem:[#allocation3 + $0x20] sm:$0xff] %vm208_vm2, %v1041_v63  ;;  %1737 = vmatmul.mubr.msk.f32.vlgmr.msra.gmra.mrb[8].mxu0 %vm208_vm2, %v1041_v63  ;;  %v1392_v63 = vsel %vm208_vm2, %v1382_v61, 0.0 }
 0xf4e   :  { %1820 = vmatpush3.bf16.msra.mxu0 %v2249_v23  ;;  %1758 = vmatprep.mubr.msk.f32.mxu0 %vm2075_vm0, %v2076_v3 }
 0xf4f   :  { %1821 = vmatprep.subr.bf16.mxu0 %v2074_v2 }
 0xf52   :  { %1823 = vmatpush3.bf16.msra.mxu0 %v2259_v27 }
0x1020   :  { %v1115_v0 = vpop.f32.mrb[8].mxu0 }
0x1021   :  { %v1126_v1 = vadd.f32 %v1115_v0, %v2282_v37  ;;  %v1738_v4 = vpop.f32.mrb[9].mxu0  ;;  %v1119_v6 = vadd.f32 %v1115_v0, %v1046_v5 }
0x1023   :  { %1128 = vrot.lane.b32.xlu1 %v1126_v1, %s2077_s22  ;;  %v1576_v7 = vmul.f32 -1.442695, %v1119_v6 }
0x1025   :  { %1873 = vpow2.f32 %v1576_v7  ;;  %v1582_v7 = vld [vmem:[#allocation5] ss:$0 sm:$0xff] }
0x102f   :  { %v1874_v9 = vpop.eup %1873 }
0x1030   :  { %v1123_v10 = vadd.f32 1.0, %v1874_v9 }
0x1032   :  { %1875 = vrcp.f32 %v1123_v10 }
0x103c   :  { %v1876_v23 = vpop.eup %1875 }
0x103d   :  { %v1138_v13 = vsub.f32 1.0, %v1876_v23  ;;  %v1144_v15 = vmul.f32 %v1876_v23, %v1038_v62  ;;  %v1370_v62 = vld [vmem:[#allocation3 + $0x20] sm:$0xff] }
0x103e   :  { %v1385_v0 = vmul.f32 %v1581_v60, %v1370_v62 }
0x1040   :  { %v1401_v4 = vsel %vm208_vm2, %v1385_v0, 0.0 }
0x1095   :  { %v1129_v11 = vpop.permute.xlu1 %1128 }
0x1096   :  { %v1131_v3 = vmul.f32 %v1876_v23, %v1129_v11 }
0x1098   :  { %1133 = vrot.lane.b32.xlu0 %v1131_v3, %s2077_s22 }
0x110a   :  { %v1134_v2 = vpop.permute.xlu0 %1133 }
0x110b   :  { %v1136_v27 = vadd.f32 %v1134_v2, %v1046_v5  ;;  %v1366_v2 = vld [vmem:[#allocation3] sm:$0xff] }
0x110d   :  { %1877 = vtanh.f32 %v1136_v27  ;;  %v1381_v27 = vmul.f32 %v1581_v60, %v1366_v2 }
0x1117   :  { %v1878_v12 = vpop.eup %1877 }
0x1118   :  { %1140 = vrot.lane.b32.xlu1 %v1878_v12, %s2079_s4  ;;  %v1368_v12 = vld [vmem:[#allocation3 + $0x10] sm:$0xff] }
0x118a   :  { %v1141_v14 = vpop.permute.xlu1 %1140 }
0x118b   :  { %v1143_v16 = vmul.f32 %v1141_v14, %v1138_v13  ;;  %v1389_v13 = vsel %vm208_vm2, %v1381_v27, 0.0  ;;  %v1383_v14 = vmul.f32 %v1581_v60, %v1368_v12 }
0x118d   :  { %v1145_v17 = vadd.f32 %v1144_v15, %v1143_v16  ;;  %v1369_v15 = vld [vmem:[#allocation3 + $0x18] sm:$0xff]  ;;  %v1395_v16 = vsel %vm208_vm2, %v1383_v14, 0.0 }
0x118f   :  { %1147 = vrot.lane.b32.xlu0 %v1145_v17, %s2079_s4 }
0x1201   :  { %v1148_v18 = vpop.permute.xlu0 %1147 }
0x1202   :  { %1151 = vst.msk [vmem:[#allocation3 + $0x28] sm:$0xff] %vm208_vm2, %v1148_v18  ;;  %1748 = vmatmul.mubr.msk.f32.vlgmr.msra.gmra.mrb[8].mxu1 %vm208_vm2, %v1148_v18 }
0x1209   :  { %v1371_v18 = vld [vmem:[#allocation3 + $0x28] sm:$0xff] }
0x12d5   :  { %v1222_v19 = vpop.f32.mrb[8].mxu1 }
0x12d6   :  { %v1233_v20 = vadd.f32 %v1222_v19, %v2282_v37  ;;  %v1749_v21 = vpop.f32.mrb[9].mxu1  ;;  %v1226_v24 = vadd.f32 %v1222_v19, %v1153_v22 }
0x12d8   :  { %1235 = vrot.lane.b32.xlu1 %v1233_v20, %s2077_s22  ;;  %v1578_v25 = vmul.f32 -1.442695, %v1226_v24  ;;  %v1386_v20 = vmul.f32 %v1581_v60, %v1371_v18  ;;  %v1488_v18 = vand.u32 127, %v396_v43 }
0x12da   :  { %1879 = vpow2.f32 %v1578_v25  ;;  %v1404_v21 = vsel %vm208_vm2, %v1386_v20, 0.0 }
0x12e4   :  { %v1880_v26 = vpop.eup %1879 }
0x12e5   :  { %v1230_v28 = vadd.f32 1.0, %v1880_v26 }
0x12e7   :  { %1881 = vrcp.f32 %v1230_v28 }
0x12f1   :  { %v1882_v29 = vpop.eup %1881 }
0x12f2   :  { %v1245_v35 = vsub.f32 1.0, %v1882_v29  ;;  %v1251_v38 = vmul.f32 %v1882_v29, %v1145_v17  ;;  %v1384_v17 = vmul.f32 %v1581_v60, %v1369_v15 }
0x12f4   :  { %v1398_v19 = vsel %vm208_vm2, %v1384_v17, 0.0 }
0x134a   :  { %v1236_v30 = vpop.permute.xlu1 %1235 }
0x134b   :  { %v1238_v31 = vmul.f32 %v1882_v29, %v1236_v30 }
0x134d   :  { %1240 = vrot.lane.b32.xlu0 %v1238_v31, %s2077_s22 }
0x13bf   :  { %v1241_v32 = vpop.permute.xlu0 %1240 }
0x13c0   :  { %v1243_v33 = vadd.f32 %v1241_v32, %v1153_v22 }
0x13c2   :  { %1883 = vtanh.f32 %v1243_v33 }
0x13cc   :  { %v1884_v34 = vpop.eup %1883 }
0x13cd   :  { %1247 = vrot.lane.b32.xlu1 %v1884_v34, %s2079_s4 }
0x143f   :  { %v1248_v36 = vpop.permute.xlu1 %1247 }
0x1440   :  { %v1250_v39 = vmul.f32 %v1248_v36, %v1245_v35 }
0x1442   :  { %v1252_v40 = vadd.f32 %v1251_v38, %v1250_v39 }
0x1444   :  { %1254 = vrot.lane.b32.xlu0 %v1252_v40, %s2079_s4 }
0x14b6   :  { %v1255_v41 = vpop.permute.xlu0 %1254 }
0x14b7   :  { %1258 = vst.msk [vmem:[#allocation3 + $0x30] sm:$0xff] %vm208_vm2, %v1255_v41  ;;  %1759 = vmatmul.mubr.msk.f32.vlgmr.msra.gmra.mrb[10].mxu0 %vm208_vm2, %v1255_v41 }
0x14be   :  { %v1372_v1 = vld [vmem:[#allocation3 + $0x30] sm:$0xff] }
0x14bf   :  { %v1387_v5 = vmul.f32 %v1581_v60, %v1372_v1 }
0x14c1   :  { %v1407_v6 = vsel %vm208_vm2, %v1387_v5, 0.0 }
0x158a   :  { %v1329_v42 = vpop.f32.mrb[10].mxu0 }
0x158b   :  { %v1340_v44 = vadd.f32 %v1329_v42, %v2282_v37  ;;  %v1760_v46 = vpop.f32.mrb[11].mxu0  ;;  %v1333_v48 = vadd.f32 %v1329_v42, %v1260_v47 }
0x158d   :  { %1342 = vrot.lane.b32.xlu1 %v1340_v44, %s2077_s22  ;;  %v1580_v49 = vmul.f32 -1.442695, %v1333_v48 }
0x158f   :  { %1885 = vpow2.f32 %v1580_v49 }
0x1599   :  { %v1886_v50 = vpop.eup %1885 }
0x159a   :  { %v1337_v51 = vadd.f32 1.0, %v1886_v50 }
0x159c   :  { %1887 = vrcp.f32 %v1337_v51 }
0x15a6   :  { %v1888_v52 = vpop.eup %1887 }
0x15a7   :  { %v1352_v9 = vsub.f32 1.0, %v1888_v52  ;;  %v1358_v23 = vmul.f32 %v1888_v52, %v1252_v40 }
0x15ff   :  { %v1343_v53 = vpop.permute.xlu1 %1342 }
0x1600   :  { %v1345_v54 = vmul.f32 %v1888_v52, %v1343_v53 }
0x1602   :  { %1347 = vrot.lane.b32.xlu0 %v1345_v54, %s2077_s22 }
0x1674   :  { %v1348_v56 = vpop.permute.xlu0 %1347 }
0x1675   :  { %v1350_v37 = vadd.f32 %v1348_v56, %v1260_v47 }
0x1677   :  { %1889 = vtanh.f32 %v1350_v37 }
0x1681   :  { %v1890_v57 = vpop.eup %1889 }
0x1682   :  { %1354 = vrot.lane.b32.xlu1 %v1890_v57, %s2079_s4 }
0x1686   :  { %366 = vrot.lane.b32.xlu1 %v1564_v58, %s2079_s4 }
0x16aa   :  { %1393 = vadd.xlane.f32.xlu1 %v1392_v63 }
0x16ae   :  { %1402 = vadd.xlane.f32.xlu1 %v1401_v4 }
0x16b2   :  { %1408 = vadd.xlane.f32.xlu1 %v1407_v6 }
0x16c3   :  { %1420 = vperm.xlu1 %1840, %v1582_v7  }
0x16f4   :  { %v1355_v10 = vpop.permute.xlu1 %1354 }
0x16f5   :  { %v1357_v11 = vmul.f32 %v1355_v10, %v1352_v9 }
0x16f7   :  { %v1359_v3 = vadd.f32 %v1358_v23, %v1357_v11 }
0x16f8   :  { %v367_v22 = vpop.permute.xlu1 %366 }
0x16f9   :  { %1361 = vrot.lane.b32.xlu0 %v1359_v3, %s2079_s4  ;;  %v369_v24 = vadd.f32 %v367_v22, %v2297_v8 }
0x16fb   :  { %v371_v25 = vmin.f32 %v369_v24, 20.0  ;;  %vm370_vm5 = vcmp.gt.f32.partialorder %v369_v24, 20.0 }
0x16fd   :  { %v372_v26 = vmul.f32 1.442695, %v371_v25 }
0x16ff   :  { %1891 = vpow2.f32 %v372_v26 }
0x1709   :  { %v1892_v29 = vpop.eup %1891 }
0x170a   :  { %v374_v32 = vadd.f32 1.0, %v1892_v29  ;;  %v377_v34 = vmul.f32 -0.5, %v1892_v29  ;;  %v380_v38 = vand.u32 2147483647, %v1892_v29 }
0x170c   :  { %1893 = vlog2.f32 %v374_v32  ;;  %v378_v36 = vadd.f32 1.0, %v377_v34  ;;  %vm381_vm4 = vcmp.lt.f32.partialorder %v380_v38, 0.0004427343 }
0x170e   :  { %v379_v8 = vmul.f32 %v1892_v29, %v378_v36 }
0x1716   :  { %v1894_v35 = vpop.eup %1893 }
0x1717   :  { %v376_v39 = vmul.f32 0.6931472, %v1894_v35 }
0x1718   :  { %1390 = vadd.xlane.f32.xlu0 %v1389_v13 }
0x1719   :  { %v382_v40 = vsel %vm381_vm4, %v379_v8, %v376_v39 }
0x171a   :  { %v383_v41 = vsel %vm370_vm5, %v369_v24, %v382_v40  ;;  %v1491_v24 = vsub.s32 %v1488_v18, %v2293_v45 }
0x171c   :  { %1396 = vadd.xlane.f32.xlu0 %v1395_v16 }
0x1720   :  { %1399 = vadd.xlane.f32.xlu0 %v1398_v19 }
0x1724   :  { %1405 = vadd.xlane.f32.xlu0 %v1404_v21 }
0x1737   :  { %v1394_v42 = vpop.xlane.xlu1 %1393 }
0x173b   :  { %v1403_v44 = vpop.xlane.xlu1 %1402 }
0x173f   :  { %v1409_v47 = vpop.xlane.xlu1 %1408 }
0x1743   :  { %v1421_v49 = vpop.permute.xlu1 %1420 }
0x1744   :  { %v1424_v51 = vadd.f32 %v1421_v49, %v1394_v42  ;;  %v1429_v62 = vadd.f32 %v1421_v49, %v1409_v47 }
0x1746   :  { %v1584_v54 = vmul.f32 -1.442695, %v1424_v51  ;;  %v1589_v0 = vmul.f32 -1.442695, %v1429_v62 }
0x1748   :  { %1895 = vpow2.f32 %v1584_v54 }
0x1752   :  { %v1896_v1 = vpop.eup %1895 }
0x1753   :  { %v1456_v6 = vadd.f32 1.0, %v1896_v1 }
0x176b   :  { %v1362_v28 = vpop.permute.xlu0 %1361 }
0x176c   :  { %1365 = vst.msk [vmem:[#allocation3 + $0x38] sm:$0xff] %vm208_vm2, %v1362_v28 }
0x1773   :  { %v1373_v30 = vld [vmem:[#allocation3 + $0x38] sm:$0xff] }
0x1774   :  { %v1388_v31 = vmul.f32 %v1581_v60, %v1373_v30  ;;  %v1427_v60 = vadd.f32 %v1421_v49, %v1403_v44 }
0x1776   :  { %v1410_v33 = vsel %vm208_vm2, %v1388_v31, 0.0  ;;  %v1587_v63 = vmul.f32 -1.442695, %v1427_v60 }
0x1777   :  { %1411 = vadd.xlane.f32.xlu0 %v1410_v33 }
0x178d   :  { %385 = vrot.lane.b32.xlu0 %v383_v41, %s2081_s10 }
0x17a5   :  { %v1391_v46 = vpop.xlane.xlu0 %1390 }
0x17a6   :  { %v1423_v52 = vadd.f32 %v1421_v49, %v1391_v46 }
0x17a8   :  { %v1583_v56 = vmul.f32 -1.442695, %v1423_v52 }
0x17a9   :  { %v1397_v48 = vpop.xlane.xlu0 %1396 }
0x17aa   :  { %v1425_v53 = vadd.f32 %v1421_v49, %v1397_v48  ;;  %1897 = vpow2.f32 %v1583_v56 }
0x17ac   :  { %v1585_v57 = vmul.f32 -1.442695, %v1425_v53 }
0x17ad   :  { %v1400_v50 = vpop.xlane.xlu0 %1399 }
0x17ae   :  { %v1426_v55 = vadd.f32 %v1421_v49, %v1400_v50  ;;  %1899 = vpow2.f32 %v1585_v57 }
0x17b0   :  { %v1586_v58 = vmul.f32 -1.442695, %v1426_v55 }
0x17b1   :  { %v1406_v37 = vpop.xlane.xlu0 %1405 }
0x17b2   :  { %v1428_v59 = vadd.f32 %v1421_v49, %v1406_v37  ;;  %1901 = vpow2.f32 %v1586_v58 }
0x17b4   :  { %v1588_v61 = vmul.f32 -1.442695, %v1428_v59  ;;  %v1898_v4 = vpop.eup %1897 }
0x17b5   :  { %v1455_v9 = vadd.f32 1.0, %v1898_v4 }
0x17b6   :  { %1903 = vpow2.f32 %v1588_v61 }
0x17b7   :  { %1905 = vpow2.f32 %v1587_v63 }
0x17b8   :  { %v1900_v5 = vpop.eup %1899  ;;  %1907 = vpow2.f32 %v1589_v0 }
0x17b9   :  { %v1457_v10 = vadd.f32 1.0, %v1900_v5  ;;  %1909 = vrcp.f32 %v1456_v6 }
0x17ba   :  { %1911 = vrcp.f32 %v1455_v9 }
0x17bb   :  { %1913 = vrcp.f32 %v1457_v10 }
0x17bc   :  { %v1902_v7 = vpop.eup %1901 }
0x17bd   :  { %v1458_v3 = vadd.f32 1.0, %v1902_v7 }
0x17c0   :  { %v1904_v2 = vpop.eup %1903 }
0x17c1   :  { %v1906_v12 = vpop.eup %1905  ;;  %v1460_v14 = vadd.f32 1.0, %v1904_v2 }
0x17c2   :  { %v1459_v15 = vadd.f32 1.0, %v1906_v12  ;;  %v1908_v16 = vpop.eup %1907 }
0x17c3   :  { %v1461_v17 = vadd.f32 1.0, %v1908_v16  ;;  %v1910_v19 = vpop.eup %1909 }
0x17c4   :  { %v1912_v20 = vpop.eup %1911  ;;  %v1496_v31 = vrot.slane %v1910_v19, %v1491_v24 }
0x17c5   :  { %v1914_v21 = vpop.eup %1913  ;;  %v1492_v28 = vrot.slane %v1912_v20, %v1491_v24 }
0x17c6   :  { %v1500_v29 = vrot.slane %v1914_v21, %v1491_v24 }
0x17c7   :  { %v1522_v43 = vsel %vm1521_vm7, %v1496_v31, %v1492_v28 }
0x17c8   :  { %v1524_v34 = vsel %vm1523_vm8, %v1500_v29, %v1522_v43 }
0x1804   :  { %v1412_v23 = vpop.xlane.xlu0 %1411 }
0x1805   :  { %v1430_v11 = vadd.f32 %v1421_v49, %v1412_v23 }
0x1807   :  { %v1590_v27 = vmul.f32 -1.442695, %v1430_v11 }
0x1808   :  { %v386_v13 = vpop.permute.xlu0 %385 }
0x1809   :  { %1915 = vpow2.f32 %v1590_v27  ;;  %389 = vst.msk [vmem:[%s2437_s12] sm:$0xff] %vm388_vm6, %v386_v13  ;;  %s2082_s12 = smov [#allocation15]  }
0x180a   :  { %1917 = vrcp.f32 %v1458_v3  ;;  %s1546_s28 = sshll.u32 %s2082_s12, 4  ;;  %s1547_s28 = int_to_ptr.vmem [resolvable:$true] %s1546_s28 }
0x180b   :  { %1919 = vrcp.f32 %v1460_v14  ;;  %s2037_s29 = scalar_lea.vmem %s1547_s28, 128  ;;  %p2042_p13 = scmp.lt.s32.totalorder %s1547_s28, %s1547_s28 }
0x180c   :  { %1921 = vrcp.f32 %v1459_v15  ;;  %p2038_p12 = scmp.ne.s32.totalorder %s1547_s28, %s2037_s29  ;;  %p2043_p0 = scmp.lt.s32.totalorder %s2037_s29, %s2037_s29 }
0x180d   :  { %1923 = vrcp.f32 %v1461_v17 }
0x180e   :  { %p2044_p1 = por %p2043_p0, %p2042_p13 }
0x1810   :  { %p2045_p2 = pnand %p2044_p1, %p2038_p12 }
0x1813   :  { %v1916_v22 = vpop.eup %1915 }
0x1814   :  { %v1918_v25 = vpop.eup %1917  ;;  %v1462_v26 = vadd.f32 1.0, %v1916_v22 }
0x1815   :  { %v1504_v30 = vrot.slane %v1918_v25, %v1491_v24  ;;  %v1920_v32 = vpop.eup %1919 }
0x1816   :  { %1925 = vrcp.f32 %v1462_v26  ;;  %v1922_v33 = vpop.eup %1921  ;;  %v1512_v35 = vrot.slane %v1920_v32, %v1491_v24 }
0x1817   :  { %v1526_v36 = vsel %vm1525_vm9, %v1504_v30, %v1524_v34  ;;  %v1508_v38 = vrot.slane %v1922_v33, %v1491_v24  ;;  %v1924_v45 = vpop.eup %1923 }
0x1818   :  { %v1516_v41 = vrot.slane %v1924_v45, %v1491_v24 }
0x1819   :  { %v1528_v39 = vsel %vm1527_vm10, %v1508_v38, %v1526_v36 }
0x181a   :  { %v1530_v8 = vsel %vm1529_vm11, %v1512_v35, %v1528_v39 }
0x181b   :  { %v1532_v44 = vsel %vm1531_vm12, %v1516_v41, %v1530_v8 }
0x1820   :  { %v1926_v40 = vpop.eup %1925 }
0x1821   :  { %v1520_v42 = vrot.slane %v1926_v40, %v1491_v24 }
0x1823   :  { %v1534_v46 = vsel %vm1533_vm13, %v1520_v42, %v1532_v44 }
0x1824   :  { %1537 = vst.msk [vmem:[#allocation15] sm:$0xff] %vm1536_vm14, %v1534_v46 }
0x1825   :  { %2048 = shalt.err (!%p2045_p2)
}
0x1826   :  { %s2049_s14 = scalar_lea.hbm %s2438_s13, 128 }
0x1827   :  { %p2050_p3 = scmp.ne.s32.totalorder %s2438_s13, %s2049_s14  ;;  %p2053_p4 = scmp.lt.u32.totalorder %s2049_s14, %s2438_s13 }
0x1829   :  { %p2055_p5 = pnand %p2053_p4, %p2050_p3 }
0x182b   :  { %2058 = shalt.err (!%p2055_p5)
}
0x182c   :  { %1549 = dma.vmem_to_hbm [thread:$0]  %s1547_s28, 128, %s2438_s13, [#allocation8]  }
0x182d   :  { %2065 = dma.done.wait [#allocation8], 128  }
0x182e   :  { %2066 = vsyncadd [#allocation8], 4294967168 }
0x182f   :  { %1555 = vsyncpa [#allocation7], 1 }
0x1830   :  { %1556 = vsyncpa [#allocation10], 1 }
0x1831   :  { %1557 = vsyncpa [#allocation13], 1 }
0x1832   :  { %1558 = vsyncpa [#allocation8], 1 }

</bundles_post_ra>
